<compile_context>
chip_gen: v6e
topology: v6e:2x2x1
jax: 0.10.0
libtpu: 0.0.40
codegen_flags: <defaults>
</compile_context>

<pallas_src>
import numpy as np
import jax
import jax.numpy as jnp
from jax.experimental import pallas as pl
from jax.experimental.pallas import tpu as pltpu


# ------------------------------ layer classes -------------------------------

class Conv2dLayer:
    """nn.Conv2d(in_ch, out_ch, 3, padding=1).

    __call__ is the plain-JAX reference path (layerwise mode + validation).
    Kernel-facing folded weight layout is precomputed once.
    """

    def __init__(self, key, in_ch, out_ch, ksize=3, padding=1):
        assert ksize == 3 and padding == 1, "fused kernel assumes 3x3, pad=1"
        k1, k2 = jax.random.split(key)
        fan_in = in_ch * ksize * ksize
        s = 1.0 / (fan_in ** 0.5)
        self.weight = jax.random.uniform(
            k1, (out_ch, in_ch, ksize, ksize), jnp.float32, -s, s)
        self.bias = jax.random.uniform(k2, (out_ch,), jnp.float32, -s, s)
        self.in_ch, self.out_ch = in_ch, out_ch
        # folded layout: w_folded[o, (dy*3+dx)*in_ch + c] = weight[o, c, dy, dx]
        self.w_folded = jnp.transpose(self.weight, (0, 2, 3, 1)).reshape(
            out_ch, 9 * in_ch)
        self.b_col = self.bias.reshape(out_ch, 1)

    def __call__(self, x):  # x: [N, C, H, W]  (plain-JAX reference)
        out = jax.lax.conv_general_dilated(
            x, self.weight, window_strides=(1, 1), padding=((1, 1), (1, 1)),
            dimension_numbers=('NCHW', 'OIHW', 'NCHW'))
        return out + self.bias[None, :, None, None]


class ReLULayer:
    def __call__(self, x):
        return jnp.maximum(x, 0.0)


class FlattenLayer:
    def __call__(self, x):
        return x.reshape(x.shape[0], -1)


class LinearLayer:
    def __init__(self, key, in_f, out_f):
        k1, k2 = jax.random.split(key)
        s = 1.0 / (in_f ** 0.5)
        self.weight = jax.random.uniform(k1, (out_f, in_f), jnp.float32, -s, s)
        self.bias = jax.random.uniform(k2, (out_f,), jnp.float32, -s, s)
        self.in_f, self.out_f = in_f, out_f
        self.w_t = self.weight.T              # [in_f, out_f] (reference path)

    def __call__(self, x):  # x: [N, in_f]  (plain-JAX reference)
        return x @ self.w_t + self.bias


class Layer:
    def __init__(self, layer_module_name, layer_object, reshape_dim=None):
        self.layer_module_name = layer_module_name
        self.layer_object = layer_object
        self.reshape_dim = reshape_dim


# ------------------------- fused Pallas forward -----------------------------

def _tap_masks(H, W, batch_tile):
    """masks[dy*3+dx, 0, b*H*W + p] = 1.0 iff pixel p=(y*W+x) of *any* image has
    a valid (y+dy-1, x+dx-1) source.  Invalid (padding) lanes are exactly the
    lanes where a lane-roll across the batch-stacked axis could pull in data
    from a neighbouring image, so the mask also enforces per-image isolation."""
    P = H * W
    y = np.arange(P) // W
    x = np.arange(P) % W
    m = np.zeros((9, batch_tile * P), np.float32)
    for dy in range(3):
        for dx in range(3):
            valid = ((y + dy - 1 >= 0) & (y + dy - 1 < H) &
                     (x + dx - 1 >= 0) & (x + dx - 1 < W)).astype(np.float32)
            m[dy * 3 + dx] = np.tile(valid, batch_tile)
    return jnp.asarray(m.reshape(9, 1, batch_tile * P))


def build_fused_forward(conv1, _relu1, conv2, _relu2, _flatten, fc, in_shape,
                        batch_tile=8, mxu_dtype=jnp.bfloat16):
    """One pallas_call for conv->relu->conv->relu->flatten->linear.

    Activation layout inside the kernel is [channels, Btile*H*W]: channels on
    sublanes, the Btile images stacked densely along lanes.  All weights and
    scratch (<2 MiB) live in VMEM.  mxu_dtype=jnp.bfloat16 uses bf16 MXU
    operands with f32 accumulation; pass jnp.float32 for a strict-f32 kernel.
    """
    B0, C1, H, W = in_shape
    P = H * W
    assert P % 128 == 0, "fused path assumes H*W is a multiple of 128"
    O1, O2, N = conv1.out_ch, conv2.out_ch, fc.out_f
    assert fc.in_f == O2 * P

    Btile = max(1, min(int(batch_tile), B0))
    nblk = -(-B0 // Btile)                       # cdiv
    B_pad = nblk * Btile
    L = Btile * P                                # lane extent per block
    NPAD = max(128, -(-N // 128) * 128)          # lane-dense output width

    # resident kernel-facing weights (precomputed once per build)
    w1 = conv1.w_folded.astype(mxu_dtype)        # [O1, 9*C1]
    w2 = conv2.w_folded.astype(mxu_dtype)        # [O2, 9*O1]
    b1, b2 = conv1.b_col, conv2.b_col            # f32 [O, 1]
    # wfc[k, n] = fc.weight[n, k] (torch flatten order k = c*P + p), N padded
    wfc = jnp.zeros((fc.in_f, NPAD), mxu_dtype).at[:, :N].set(
        fc.weight.T.astype(mxu_dtype))
    bfc = jnp.zeros((1, NPAD), jnp.float32).at[:, :N].set(fc.bias)
    masks = _tap_masks(H, W, Btile)              # [9, 1, L] f32 (tiny, resident)

    def kernel(x_ref, w1_ref, b1_ref, w2_ref, b2_ref, wfc_ref, bfc_ref, m_ref,
               o_ref, stk1, stk2, fcs):

        def stack_taps(act, stk_ref, cin):
            # stk_ref[t*cin + c, :] = tap-t shifted copy of channel c; lanes
            # whose 3x3 tap falls in the zero padding (or would wrap into the
            # neighbouring lane-stacked image) are zeroed by the mask.
            for t in range(9):
                dy, dx = t // 3, t % 3
                s = (dy - 1) * W + (dx - 1)
                if s == 0:
                    src = act                                    # center tap
                else:
                    src = pltpu.roll(act, shift=(-s) % L, axis=1) * m_ref[t]
                stk_ref[pl.ds(t * cin, cin), :] = src

        # ---- conv1 + bias + ReLU : ONE MXU dot, K = 9*C1 -------------------
        stack_taps(x_ref[...], stk1, C1)
        h1 = jnp.dot(w1_ref[...], stk1[...].astype(mxu_dtype),
                     preferred_element_type=jnp.float32)
        h1 = jnp.maximum(h1 + b1_ref[...], 0.0)                  # [O1, L] f32

        # ---- conv2 + bias + ReLU : ONE MXU dot, K = 9*O1 -------------------
        stack_taps(h1, stk2, O1)
        h2 = jnp.dot(w2_ref[...], stk2[...].astype(mxu_dtype),
                     preferred_element_type=jnp.float32)
        h2 = jnp.maximum(h2 + b2_ref[...], 0.0)                  # [O2, L] f32

        # ---- flatten (torch order c*P+p) + linear : ONE MXU dot, K = O2*P --
        # untangle lane-stacked (c, b*P+p) -> row b, lane c*P+p via VMEM stage
        for c in range(O2):
            for b in range(Btile):
                fcs[pl.ds(b, 1), pl.ds(c * P, P)] = h2[c:c + 1,
                                                       b * P:(b + 1) * P]
        acc = jnp.dot(fcs[...].astype(mxu_dtype), wfc_ref[...],
                      preferred_element_type=jnp.float32)        # [Btile, NPAD]
        o_ref[...] = acc + bfc_ref[...]          # lane-dense (128-wide) store

    pc = pl.pallas_call(
        kernel,
        out_shape=jax.ShapeDtypeStruct((B_pad, NPAD), jnp.float32),
        grid=(nblk,),
        in_specs=[
            pl.BlockSpec((C1, L), lambda i: (0, i)),          # x (batch block)
            pl.BlockSpec((O1, 9 * C1), lambda i: (0, 0)),     # w1 (resident)
            pl.BlockSpec((O1, 1), lambda i: (0, 0)),          # b1
            pl.BlockSpec((O2, 9 * O1), lambda i: (0, 0)),     # w2
            pl.BlockSpec((O2, 1), lambda i: (0, 0)),          # b2
            pl.BlockSpec((fc.in_f, NPAD), lambda i: (0, 0)),  # wfc (resident)
            pl.BlockSpec((1, NPAD), lambda i: (0, 0)),        # bfc
            pl.BlockSpec((9, 1, L), lambda i: (0, 0, 0)),     # boundary masks
        ],
        out_specs=pl.BlockSpec((Btile, NPAD), lambda i: (i, 0)),
        scratch_shapes=[
            pltpu.VMEM((9 * C1, L), jnp.float32),   # stacked taps, conv1
            pltpu.VMEM((9 * O1, L), jnp.float32),   # stacked taps, conv2
            pltpu.VMEM((Btile, O2 * P), jnp.float32),  # flattened FC input
        ],
        compiler_params=pltpu.CompilerParams(
            # batch-block axis is independent -> megacore sharding when nblk>=2
            dimension_semantics=("parallel",)),
    )

    @jax.jit
    def forward(x):
        xb = x
        if B_pad != B0:
            xb = jnp.pad(xb, ((0, B_pad - B0), (0, 0), (0, 0), (0, 0)))
        # lane-dense layout: xk[c, b*P + p] = x[b, c, y, w]
        xk = jnp.transpose(xb, (1, 0, 2, 3)).reshape(C1, B_pad * P)
        out = pc(xk, w1, b1, w2, b2, wfc, bfc, masks)
        return out[:B0, :N]

    return forward


# ------------------------------ SandboxModel --------------------------------

class SandboxModel:
    def __init__(self, layers, layerwise=False):
        if not layers:
            raise Exception('Layers not provided!')
        self.layers = layers
        self.layerwise = layerwise
        self.active_layer = None
        self.__layer_iter = iter(self.layers)
        self._fused_forward = None
        self._fused_in_shape = None

    def __iter__(self):
        self.active_layer = self.layers[0]
        return self

    def __next__(self):
        curr = self.active_layer
        if not curr:
            raise StopIteration
        self.active_layer = next(self.__layer_iter)
        return curr

    def set_active_layer(self, layer_index):
        self.active_layer = self.layers[layer_index]

    def _call(self, x, func, reshape_dim=None):
        if reshape_dim:
            # TODO(synk): torchvision Resize uses antialiased bilinear on
            # downscale; jax.image.resize has no antialias, so results diverge
            # numerically if reshape_dim is ever used with downscaling.
            n, c = x.shape[0], x.shape[1]
            x = jax.image.resize(
                x, (n, c, reshape_dim[2], reshape_dim[3]), method='bilinear')
            x = jnp.broadcast_to(x, tuple(reshape_dim))
            print(x.shape)
        return func(x)

    def _fusible_pattern(self):
        pattern = [Conv2dLayer, ReLULayer, Conv2dLayer, ReLULayer,
                   FlattenLayer, LinearLayer]
        return (len(self.layers) == len(pattern)
                and all(isinstance(l.layer_object, t)
                        for l, t in zip(self.layers, pattern))
                and all(l.reshape_dim is None for l in self.layers))

    def _fusible_for(self, x):
        if not self._fusible_pattern() or x.ndim != 4:
            return False
        conv1 = self.layers[0].layer_object
        conv2 = self.layers[2].layer_object
        fc = self.layers[5].layer_object
        H, W = int(x.shape[2]), int(x.shape[3])
        return ((H * W) % 128 == 0
                and conv1.in_ch == int(x.shape[1])
                and fc.in_f == conv2.out_ch * H * W)

    def forward(self, x):
        # NOTE: the original PyTorch forward never returns x_ (returns None);
        # we return it here so the result can be verified.
        if self.layerwise:
            x_ = self._call(x, self.active_layer.layer_object,
                            self.active_layer.reshape_dim)
            print(f'Ran {self.active_layer.layer_module_name}')
            return x_

        if self._fusible_for(x):
            if (self._fused_forward is None
                    or self._fused_in_shape != tuple(x.shape)):
                objs = [l.layer_object for l in self.layers]
                self._fused_forward = build_fused_forward(
                    *objs, in_shape=tuple(x.shape))
                self._fused_in_shape = tuple(x.shape)
            x_ = self._fused_forward(x)          # one fused Pallas kernel
            for layer in self.layers:            # prints stay outside the trace
                print(f'Ran {layer.layer_module_name}')
            return x_

        # generic fallback: run layers one by one (plain-JAX reference path)
        x_ = x
        for layer in self.layers:
            x_ = self._call(x_, layer.layer_object, layer.reshape_dim)
            print(f'Ran {layer.layer_module_name}')
        return x_

    def __call__(self, x):
        return self.forward(x)


# ---------------------------------- main -------------------------------------

if __name__ == "__main__":
    key = jax.random.PRNGKey(0)
    k_x, k_c1, k_c2, k_fc = jax.random.split(key, 4)

    B, C, H, W = 2, 4, 16, 16
    HIDDEN = 32
    x = jax.random.normal(k_x, (B, C, H, W), dtype=jnp.float32)

    layers = [
        Layer("Conv2d(4,8,3,p=1)", Conv2dLayer(k_c1, C, 8)),
        Layer("ReLU", ReLULayer()),
        Layer("Conv2d(8,8,3,p=1)", Conv2dLayer(k_c2, 8, 8)),
        Layer("ReLU", ReLULayer()),
        Layer("Flatten", FlattenLayer()),
        Layer(f"Linear({8 * H * W},{HIDDEN})", LinearLayer(k_fc, 8 * H * W, HIDDEN)),
    ]

    model = SandboxModel(layers, layerwise=False)
    out = jax.block_until_ready(model(x))
    assert out.shape == (B, HIDDEN), out.shape
    assert bool(jnp.all(jnp.isfinite(out)))

    # Correctness: the layer-by-layer plain-JAX path (same code layerwise mode
    # runs) serves as the reference for the fused Pallas forward.  Tolerance
    # 2e-2 accounts for the bf16 MXU operands (f32 accumulation).
    ref = x
    for layer in layers:
        ref = layer.layer_object(ref)
    ref = jax.block_until_ready(ref)
    max_err = float(jnp.max(jnp.abs(out - ref)))
    assert bool(jnp.allclose(out, ref, rtol=2e-2, atol=2e-2)), \
        f"fused kernel mismatch, max abs err = {max_err}"

    print("KERNEL_OK")
</pallas_src>

<mosaic_0001>
module attributes {stable_mosaic.version = 11 : i64} {
  func.func @kernel(%arg0: i32, %arg1: memref<4x512xf32, #tpu.memory_space<vmem>>, %arg2: memref<8x36xbf16, #tpu.memory_space<vmem>>, %arg3: memref<8x1xf32, #tpu.memory_space<vmem>>, %arg4: memref<8x72xbf16, #tpu.memory_space<vmem>>, %arg5: memref<8x1xf32, #tpu.memory_space<vmem>>, %arg6: memref<2048x128xbf16, #tpu.memory_space<vmem>>, %arg7: memref<1x128xf32, #tpu.memory_space<vmem>>, %arg8: memref<9x1x512xf32, #tpu.memory_space<vmem>>, %arg9: memref<2x128xf32, #tpu.memory_space<vmem>>, %arg10: memref<36x512xf32, #tpu.memory_space<vmem>>, %arg11: memref<72x512xf32, #tpu.memory_space<vmem>>, %arg12: memref<2x2048xf32, #tpu.memory_space<vmem>>) attributes {dimension_semantics = [#tpu.dimension_semantics<parallel>], iteration_bounds = array<i64: 1>, scalar_prefetch = 0 : i64, scratch_operands = 3 : i64, tpu.core_type = #tpu.core_type<tc>, window_params = [{transform_indices = @transform_0, window_bounds = array<i64: 4, 512>}, {pipeline_mode = #tpu.pipeline_mode<synchronous>, transform_indices = @transform_1, window_bounds = array<i64: 8, 36>}, {pipeline_mode = #tpu.pipeline_mode<synchronous>, transform_indices = @transform_2, window_bounds = array<i64: 8, 1>}, {pipeline_mode = #tpu.pipeline_mode<synchronous>, transform_indices = @transform_3, window_bounds = array<i64: 8, 72>}, {pipeline_mode = #tpu.pipeline_mode<synchronous>, transform_indices = @transform_4, window_bounds = array<i64: 8, 1>}, {pipeline_mode = #tpu.pipeline_mode<synchronous>, transform_indices = @transform_5, window_bounds = array<i64: 2048, 128>}, {pipeline_mode = #tpu.pipeline_mode<synchronous>, transform_indices = @transform_6, window_bounds = array<i64: 1, 128>}, {pipeline_mode = #tpu.pipeline_mode<synchronous>, transform_indices = @transform_7, window_bounds = array<i64: 9, 1, 512>}, {transform_indices = @transform_8, window_bounds = array<i64: 2, 128>}]} {
    %c0 = arith.constant 0 : index
    %c0_0 = arith.constant 0 : index
    %0 = vector.load %arg1[%c0, %c0_0] : memref<4x512xf32, #tpu.memory_space<vmem>>, vector<4x512xf32>
    %c17_i32 = arith.constant 17 : i32
    %1 = tpu.dynamic_rotate %0 by %c17_i32 dim 1 : vector<4x512xf32>, i32 -> vector<4x512xf32>
    %c0_1 = arith.constant 0 : index
    %c0_2 = arith.constant 0 : index
    %c0_3 = arith.constant 0 : index
    %2 = vector.load %arg8[%c0_1, %c0_2, %c0_3] : memref<9x1x512xf32, #tpu.memory_space<vmem>>, vector<1x1x512xf32>
    %3 = vector.shape_cast %2 : vector<1x1x512xf32> to vector<1x512xf32>
    %4 = vector.broadcast %3 : vector<1x512xf32> to vector<4x512xf32>
    %5 = arith.mulf %1, %4 : vector<4x512xf32>
    %c0_4 = arith.constant 0 : index
    %c0_5 = arith.constant 0 : index
    %6 = vector.load %arg10[%c0_4, %c0_5] : memref<36x512xf32, #tpu.memory_space<vmem>>, vector<4x512xf32>
    tpu.vector_store %arg10[%c0_4, %c0_5], %5 {strides = array<i32>} : memref<36x512xf32, #tpu.memory_space<vmem>>, vector<4x512xf32>,
    %c16_i32 = arith.constant 16 : i32
    %7 = tpu.dynamic_rotate %0 by %c16_i32 dim 1 : vector<4x512xf32>, i32 -> vector<4x512xf32>
    %c1 = arith.constant 1 : index
    %c0_6 = arith.constant 0 : index
    %c0_7 = arith.constant 0 : index
    %8 = vector.load %arg8[%c1, %c0_6, %c0_7] : memref<9x1x512xf32, #tpu.memory_space<vmem>>, vector<1x1x512xf32>
    %9 = vector.shape_cast %8 : vector<1x1x512xf32> to vector<1x512xf32>
    %10 = vector.broadcast %9 : vector<1x512xf32> to vector<4x512xf32>
    %11 = arith.mulf %7, %10 : vector<4x512xf32>
    %c4 = arith.constant 4 : index
    %c0_8 = arith.constant 0 : index
    %12 = vector.load %arg10[%c4, %c0_8] : memref<36x512xf32, #tpu.memory_space<vmem>>, vector<4x512xf32>
    tpu.vector_store %arg10[%c4, %c0_8], %11 {strides = array<i32>} : memref<36x512xf32, #tpu.memory_space<vmem>>, vector<4x512xf32>,
    %c15_i32 = arith.constant 15 : i32
    %13 = tpu.dynamic_rotate %0 by %c15_i32 dim 1 : vector<4x512xf32>, i32 -> vector<4x512xf32>
    %c2 = arith.constant 2 : index
    %c0_9 = arith.constant 0 : index
    %c0_10 = arith.constant 0 : index
    %14 = vector.load %arg8[%c2, %c0_9, %c0_10] : memref<9x1x512xf32, #tpu.memory_space<vmem>>, vector<1x1x512xf32>
    %15 = vector.shape_cast %14 : vector<1x1x512xf32> to vector<1x512xf32>
    %16 = vector.broadcast %15 : vector<1x512xf32> to vector<4x512xf32>
    %17 = arith.mulf %13, %16 : vector<4x512xf32>
    %c8 = arith.constant 8 : index
    %c0_11 = arith.constant 0 : index
    %18 = vector.load %arg10[%c8, %c0_11] : memref<36x512xf32, #tpu.memory_space<vmem>>, vector<4x512xf32>
    tpu.vector_store %arg10[%c8, %c0_11], %17 {strides = array<i32>} : memref<36x512xf32, #tpu.memory_space<vmem>>, vector<4x512xf32>,
    %c1_i32 = arith.constant 1 : i32
    %19 = tpu.dynamic_rotate %0 by %c1_i32 dim 1 : vector<4x512xf32>, i32 -> vector<4x512xf32>
    %c3 = arith.constant 3 : index
    %c0_12 = arith.constant 0 : index
    %c0_13 = arith.constant 0 : index
    %20 = vector.load %arg8[%c3, %c0_12, %c0_13] : memref<9x1x512xf32, #tpu.memory_space<vmem>>, vector<1x1x512xf32>
    %21 = vector.shape_cast %20 : vector<1x1x512xf32> to vector<1x512xf32>
    %22 = vector.broadcast %21 : vector<1x512xf32> to vector<4x512xf32>
    %23 = arith.mulf %19, %22 : vector<4x512xf32>
    %c12 = arith.constant 12 : index
    %c0_14 = arith.constant 0 : index
    %24 = vector.load %arg10[%c12, %c0_14] : memref<36x512xf32, #tpu.memory_space<vmem>>, vector<4x512xf32>
    tpu.vector_store %arg10[%c12, %c0_14], %23 {strides = array<i32>} : memref<36x512xf32, #tpu.memory_space<vmem>>, vector<4x512xf32>,
    %c16 = arith.constant 16 : index
    %c0_15 = arith.constant 0 : index
    %25 = vector.load %arg10[%c16, %c0_15] : memref<36x512xf32, #tpu.memory_space<vmem>>, vector<4x512xf32>
    tpu.vector_store %arg10[%c16, %c0_15], %0 {strides = array<i32>} : memref<36x512xf32, #tpu.memory_space<vmem>>, vector<4x512xf32>,
    %c511_i32 = arith.constant 511 : i32
    %26 = tpu.dynamic_rotate %0 by %c511_i32 dim 1 : vector<4x512xf32>, i32 -> vector<4x512xf32>
    %c5 = arith.constant 5 : index
    %c0_16 = arith.constant 0 : index
    %c0_17 = arith.constant 0 : index
    %27 = vector.load %arg8[%c5, %c0_16, %c0_17] : memref<9x1x512xf32, #tpu.memory_space<vmem>>, vector<1x1x512xf32>
    %28 = vector.shape_cast %27 : vector<1x1x512xf32> to vector<1x512xf32>
    %29 = vector.broadcast %28 : vector<1x512xf32> to vector<4x512xf32>
    %30 = arith.mulf %26, %29 : vector<4x512xf32>
    %c20 = arith.constant 20 : index
    %c0_18 = arith.constant 0 : index
    %31 = vector.load %arg10[%c20, %c0_18] : memref<36x512xf32, #tpu.memory_space<vmem>>, vector<4x512xf32>
    tpu.vector_store %arg10[%c20, %c0_18], %30 {strides = array<i32>} : memref<36x512xf32, #tpu.memory_space<vmem>>, vector<4x512xf32>,
    %c497_i32 = arith.constant 497 : i32
    %32 = tpu.dynamic_rotate %0 by %c497_i32 dim 1 : vector<4x512xf32>, i32 -> vector<4x512xf32>
    %c6 = arith.constant 6 : index
    %c0_19 = arith.constant 0 : index
    %c0_20 = arith.constant 0 : index
    %33 = vector.load %arg8[%c6, %c0_19, %c0_20] : memref<9x1x512xf32, #tpu.memory_space<vmem>>, vector<1x1x512xf32>
    %34 = vector.shape_cast %33 : vector<1x1x512xf32> to vector<1x512xf32>
    %35 = vector.broadcast %34 : vector<1x512xf32> to vector<4x512xf32>
    %36 = arith.mulf %32, %35 : vector<4x512xf32>
    %c24 = arith.constant 24 : index
    %c0_21 = arith.constant 0 : index
    %37 = vector.load %arg10[%c24, %c0_21] : memref<36x512xf32, #tpu.memory_space<vmem>>, vector<4x512xf32>
    tpu.vector_store %arg10[%c24, %c0_21], %36 {strides = array<i32>} : memref<36x512xf32, #tpu.memory_space<vmem>>, vector<4x512xf32>,
    %c496_i32 = arith.constant 496 : i32
    %38 = tpu.dynamic_rotate %0 by %c496_i32 dim 1 : vector<4x512xf32>, i32 -> vector<4x512xf32>
    %c7 = arith.constant 7 : index
    %c0_22 = arith.constant 0 : index
    %c0_23 = arith.constant 0 : index
    %39 = vector.load %arg8[%c7, %c0_22, %c0_23] : memref<9x1x512xf32, #tpu.memory_space<vmem>>, vector<1x1x512xf32>
    %40 = vector.shape_cast %39 : vector<1x1x512xf32> to vector<1x512xf32>
    %41 = vector.broadcast %40 : vector<1x512xf32> to vector<4x512xf32>
    %42 = arith.mulf %38, %41 : vector<4x512xf32>
    %c28 = arith.constant 28 : index
    %c0_24 = arith.constant 0 : index
    %43 = vector.load %arg10[%c28, %c0_24] : memref<36x512xf32, #tpu.memory_space<vmem>>, vector<4x512xf32>
    tpu.vector_store %arg10[%c28, %c0_24], %42 {strides = array<i32>} : memref<36x512xf32, #tpu.memory_space<vmem>>, vector<4x512xf32>,
    %c495_i32 = arith.constant 495 : i32
    %44 = tpu.dynamic_rotate %0 by %c495_i32 dim 1 : vector<4x512xf32>, i32 -> vector<4x512xf32>
    %c8_25 = arith.constant 8 : index
    %c0_26 = arith.constant 0 : index
    %c0_27 = arith.constant 0 : index
    %45 = vector.load %arg8[%c8_25, %c0_26, %c0_27] : memref<9x1x512xf32, #tpu.memory_space<vmem>>, vector<1x1x512xf32>
    %46 = vector.shape_cast %45 : vector<1x1x512xf32> to vector<1x512xf32>
    %47 = vector.broadcast %46 : vector<1x512xf32> to vector<4x512xf32>
    %48 = arith.mulf %44, %47 : vector<4x512xf32>
    %c32 = arith.constant 32 : index
    %c0_28 = arith.constant 0 : index
    %49 = vector.load %arg10[%c32, %c0_28] : memref<36x512xf32, #tpu.memory_space<vmem>>, vector<4x512xf32>
    tpu.vector_store %arg10[%c32, %c0_28], %48 {strides = array<i32>} : memref<36x512xf32, #tpu.memory_space<vmem>>, vector<4x512xf32>,
    %c0_29 = arith.constant 0 : index
    %c0_30 = arith.constant 0 : index
    %50 = vector.load %arg2[%c0_29, %c0_30] : memref<8x36xbf16, #tpu.memory_space<vmem>>, vector<8x36xbf16>
    %c0_31 = arith.constant 0 : index
    %c0_32 = arith.constant 0 : index
    %51 = vector.load %arg10[%c0_31, %c0_32] : memref<36x512xf32, #tpu.memory_space<vmem>>, vector<36x512xf32>
    %52 = arith.truncf %51 : vector<36x512xf32> to vector<36x512xbf16>
    %cst = arith.constant dense<0.000000e+00> : vector<8x512xf32>
    %53 = tpu.matmul %50, %52, %cst {dimension_numbers = #tpu.dot_dimension_numbers<[1], [0], [0], [1], [0, 0, 1, 1], [], []>} : vector<8x36xbf16>, vector<36x512xbf16>, vector<8x512xf32> -> vector<8x512xf32>
    %c0_33 = arith.constant 0 : index
    %c0_34 = arith.constant 0 : index
    %54 = vector.load %arg3[%c0_33, %c0_34] : memref<8x1xf32, #tpu.memory_space<vmem>>, vector<8x1xf32>
    %55 = vector.broadcast %54 : vector<8x1xf32> to vector<8x512xf32>
    %56 = arith.addf %53, %55 : vector<8x512xf32>
    %cst_35 = arith.constant 0.000000e+00 : f32
    %57 = vector.broadcast %cst_35 : f32 to vector<8x512xf32>
    %58 = arith.maximumf %56, %57 : vector<8x512xf32>
    %c17_i32_36 = arith.constant 17 : i32
    %59 = tpu.dynamic_rotate %58 by %c17_i32_36 dim 1 : vector<8x512xf32>, i32 -> vector<8x512xf32>
    %c0_37 = arith.constant 0 : index
    %c0_38 = arith.constant 0 : index
    %c0_39 = arith.constant 0 : index
    %60 = vector.load %arg8[%c0_37, %c0_38, %c0_39] : memref<9x1x512xf32, #tpu.memory_space<vmem>>, vector<1x1x512xf32>
    %61 = vector.shape_cast %60 : vector<1x1x512xf32> to vector<1x512xf32>
    %62 = vector.broadcast %61 : vector<1x512xf32> to vector<8x512xf32>
    %63 = arith.mulf %59, %62 : vector<8x512xf32>
    %c0_40 = arith.constant 0 : index
    %c0_41 = arith.constant 0 : index
    %64 = vector.load %arg11[%c0_40, %c0_41] : memref<72x512xf32, #tpu.memory_space<vmem>>, vector<8x512xf32>
    tpu.vector_store %arg11[%c0_40, %c0_41], %63 {strides = array<i32>} : memref<72x512xf32, #tpu.memory_space<vmem>>, vector<8x512xf32>,
    %c16_i32_42 = arith.constant 16 : i32
    %65 = tpu.dynamic_rotate %58 by %c16_i32_42 dim 1 : vector<8x512xf32>, i32 -> vector<8x512xf32>
    %c1_43 = arith.constant 1 : index
    %c0_44 = arith.constant 0 : index
    %c0_45 = arith.constant 0 : index
    %66 = vector.load %arg8[%c1_43, %c0_44, %c0_45] : memref<9x1x512xf32, #tpu.memory_space<vmem>>, vector<1x1x512xf32>
    %67 = vector.shape_cast %66 : vector<1x1x512xf32> to vector<1x512xf32>
    %68 = vector.broadcast %67 : vector<1x512xf32> to vector<8x512xf32>
    %69 = arith.mulf %65, %68 : vector<8x512xf32>
    %c8_46 = arith.constant 8 : index
    %c0_47 = arith.constant 0 : index
    %70 = vector.load %arg11[%c8_46, %c0_47] : memref<72x512xf32, #tpu.memory_space<vmem>>, vector<8x512xf32>
    tpu.vector_store %arg11[%c8_46, %c0_47], %69 {strides = array<i32>} : memref<72x512xf32, #tpu.memory_space<vmem>>, vector<8x512xf32>,
    %c15_i32_48 = arith.constant 15 : i32
    %71 = tpu.dynamic_rotate %58 by %c15_i32_48 dim 1 : vector<8x512xf32>, i32 -> vector<8x512xf32>
    %c2_49 = arith.constant 2 : index
    %c0_50 = arith.constant 0 : index
    %c0_51 = arith.constant 0 : index
    %72 = vector.load %arg8[%c2_49, %c0_50, %c0_51] : memref<9x1x512xf32, #tpu.memory_space<vmem>>, vector<1x1x512xf32>
    %73 = vector.shape_cast %72 : vector<1x1x512xf32> to vector<1x512xf32>
    %74 = vector.broadcast %73 : vector<1x512xf32> to vector<8x512xf32>
    %75 = arith.mulf %71, %74 : vector<8x512xf32>
    %c16_52 = arith.constant 16 : index
    %c0_53 = arith.constant 0 : index
    %76 = vector.load %arg11[%c16_52, %c0_53] : memref<72x512xf32, #tpu.memory_space<vmem>>, vector<8x512xf32>
    tpu.vector_store %arg11[%c16_52, %c0_53], %75 {strides = array<i32>} : memref<72x512xf32, #tpu.memory_space<vmem>>, vector<8x512xf32>,
    %c1_i32_54 = arith.constant 1 : i32
    %77 = tpu.dynamic_rotate %58 by %c1_i32_54 dim 1 : vector<8x512xf32>, i32 -> vector<8x512xf32>
    %c3_55 = arith.constant 3 : index
    %c0_56 = arith.constant 0 : index
    %c0_57 = arith.constant 0 : index
    %78 = vector.load %arg8[%c3_55, %c0_56, %c0_57] : memref<9x1x512xf32, #tpu.memory_space<vmem>>, vector<1x1x512xf32>
    %79 = vector.shape_cast %78 : vector<1x1x512xf32> to vector<1x512xf32>
    %80 = vector.broadcast %79 : vector<1x512xf32> to vector<8x512xf32>
    %81 = arith.mulf %77, %80 : vector<8x512xf32>
    %c24_58 = arith.constant 24 : index
    %c0_59 = arith.constant 0 : index
    %82 = vector.load %arg11[%c24_58, %c0_59] : memref<72x512xf32, #tpu.memory_space<vmem>>, vector<8x512xf32>
    tpu.vector_store %arg11[%c24_58, %c0_59], %81 {strides = array<i32>} : memref<72x512xf32, #tpu.memory_space<vmem>>, vector<8x512xf32>,
    %c32_60 = arith.constant 32 : index
    %c0_61 = arith.constant 0 : index
    %83 = vector.load %arg11[%c32_60, %c0_61] : memref<72x512xf32, #tpu.memory_space<vmem>>, vector<8x512xf32>
    tpu.vector_store %arg11[%c32_60, %c0_61], %58 {strides = array<i32>} : memref<72x512xf32, #tpu.memory_space<vmem>>, vector<8x512xf32>,
    %c511_i32_62 = arith.constant 511 : i32
    %84 = tpu.dynamic_rotate %58 by %c511_i32_62 dim 1 : vector<8x512xf32>, i32 -> vector<8x512xf32>
    %c5_63 = arith.constant 5 : index
    %c0_64 = arith.constant 0 : index
    %c0_65 = arith.constant 0 : index
    %85 = vector.load %arg8[%c5_63, %c0_64, %c0_65] : memref<9x1x512xf32, #tpu.memory_space<vmem>>, vector<1x1x512xf32>
    %86 = vector.shape_cast %85 : vector<1x1x512xf32> to vector<1x512xf32>
    %87 = vector.broadcast %86 : vector<1x512xf32> to vector<8x512xf32>
    %88 = arith.mulf %84, %87 : vector<8x512xf32>
    %c40 = arith.constant 40 : index
    %c0_66 = arith.constant 0 : index
    %89 = vector.load %arg11[%c40, %c0_66] : memref<72x512xf32, #tpu.memory_space<vmem>>, vector<8x512xf32>
    tpu.vector_store %arg11[%c40, %c0_66], %88 {strides = array<i32>} : memref<72x512xf32, #tpu.memory_space<vmem>>, vector<8x512xf32>,
    %c497_i32_67 = arith.constant 497 : i32
    %90 = tpu.dynamic_rotate %58 by %c497_i32_67 dim 1 : vector<8x512xf32>, i32 -> vector<8x512xf32>
    %c6_68 = arith.constant 6 : index
    %c0_69 = arith.constant 0 : index
    %c0_70 = arith.constant 0 : index
    %91 = vector.load %arg8[%c6_68, %c0_69, %c0_70] : memref<9x1x512xf32, #tpu.memory_space<vmem>>, vector<1x1x512xf32>
    %92 = vector.shape_cast %91 : vector<1x1x512xf32> to vector<1x512xf32>
    %93 = vector.broadcast %92 : vector<1x512xf32> to vector<8x512xf32>
    %94 = arith.mulf %90, %93 : vector<8x512xf32>
    %c48 = arith.constant 48 : index
    %c0_71 = arith.constant 0 : index
    %95 = vector.load %arg11[%c48, %c0_71] : memref<72x512xf32, #tpu.memory_space<vmem>>, vector<8x512xf32>
    tpu.vector_store %arg11[%c48, %c0_71], %94 {strides = array<i32>} : memref<72x512xf32, #tpu.memory_space<vmem>>, vector<8x512xf32>,
    %c496_i32_72 = arith.constant 496 : i32
    %96 = tpu.dynamic_rotate %58 by %c496_i32_72 dim 1 : vector<8x512xf32>, i32 -> vector<8x512xf32>
    %c7_73 = arith.constant 7 : index
    %c0_74 = arith.constant 0 : index
    %c0_75 = arith.constant 0 : index
    %97 = vector.load %arg8[%c7_73, %c0_74, %c0_75] : memref<9x1x512xf32, #tpu.memory_space<vmem>>, vector<1x1x512xf32>
    %98 = vector.shape_cast %97 : vector<1x1x512xf32> to vector<1x512xf32>
    %99 = vector.broadcast %98 : vector<1x512xf32> to vector<8x512xf32>
    %100 = arith.mulf %96, %99 : vector<8x512xf32>
    %c56 = arith.constant 56 : index
    %c0_76 = arith.constant 0 : index
    %101 = vector.load %arg11[%c56, %c0_76] : memref<72x512xf32, #tpu.memory_space<vmem>>, vector<8x512xf32>
    tpu.vector_store %arg11[%c56, %c0_76], %100 {strides = array<i32>} : memref<72x512xf32, #tpu.memory_space<vmem>>, vector<8x512xf32>,
    %c495_i32_77 = arith.constant 495 : i32
    %102 = tpu.dynamic_rotate %58 by %c495_i32_77 dim 1 : vector<8x512xf32>, i32 -> vector<8x512xf32>
    %c8_78 = arith.constant 8 : index
    %c0_79 = arith.constant 0 : index
    %c0_80 = arith.constant 0 : index
    %103 = vector.load %arg8[%c8_78, %c0_79, %c0_80] : memref<9x1x512xf32, #tpu.memory_space<vmem>>, vector<1x1x512xf32>
    %104 = vector.shape_cast %103 : vector<1x1x512xf32> to vector<1x512xf32>
    %105 = vector.broadcast %104 : vector<1x512xf32> to vector<8x512xf32>
    %106 = arith.mulf %102, %105 : vector<8x512xf32>
    %c64 = arith.constant 64 : index
    %c0_81 = arith.constant 0 : index
    %107 = vector.load %arg11[%c64, %c0_81] : memref<72x512xf32, #tpu.memory_space<vmem>>, vector<8x512xf32>
    tpu.vector_store %arg11[%c64, %c0_81], %106 {strides = array<i32>} : memref<72x512xf32, #tpu.memory_space<vmem>>, vector<8x512xf32>,
    %c0_82 = arith.constant 0 : index
    %c0_83 = arith.constant 0 : index
    %108 = vector.load %arg4[%c0_82, %c0_83] : memref<8x72xbf16, #tpu.memory_space<vmem>>, vector<8x72xbf16>
    %c0_84 = arith.constant 0 : index
    %c0_85 = arith.constant 0 : index
    %109 = vector.load %arg11[%c0_84, %c0_85] : memref<72x512xf32, #tpu.memory_space<vmem>>, vector<72x512xf32>
    %110 = arith.truncf %109 : vector<72x512xf32> to vector<72x512xbf16>
    %cst_86 = arith.constant dense<0.000000e+00> : vector<8x512xf32>
    %111 = tpu.matmul %108, %110, %cst_86 {dimension_numbers = #tpu.dot_dimension_numbers<[1], [0], [0], [1], [0, 0, 1, 1], [], []>} : vector<8x72xbf16>, vector<72x512xbf16>, vector<8x512xf32> -> vector<8x512xf32>
    %c0_87 = arith.constant 0 : index
    %c0_88 = arith.constant 0 : index
    %112 = vector.load %arg5[%c0_87, %c0_88] : memref<8x1xf32, #tpu.memory_space<vmem>>, vector<8x1xf32>
    %113 = vector.broadcast %112 : vector<8x1xf32> to vector<8x512xf32>
    %114 = arith.addf %111, %113 : vector<8x512xf32>
    %cst_89 = arith.constant 0.000000e+00 : f32
    %115 = vector.broadcast %cst_89 : f32 to vector<8x512xf32>
    %116 = arith.maximumf %114, %115 : vector<8x512xf32>
    %117 = vector.extract_strided_slice %116 {offsets = [0, 0], sizes = [1, 256], strides = [1, 1]} : vector<8x512xf32> to vector<1x256xf32>
    %c0_90 = arith.constant 0 : index
    %c0_91 = arith.constant 0 : index
    %118 = vector.load %arg12[%c0_90, %c0_91] : memref<2x2048xf32, #tpu.memory_space<vmem>>, vector<1x256xf32>
    tpu.vector_store %arg12[%c0_90, %c0_91], %117 {strides = array<i32>} : memref<2x2048xf32, #tpu.memory_space<vmem>>, vector<1x256xf32>,
    %119 = vector.extract_strided_slice %116 {offsets = [0, 256], sizes = [1, 256], strides = [1, 1]} : vector<8x512xf32> to vector<1x256xf32>
    %c1_92 = arith.constant 1 : index
    %c0_93 = arith.constant 0 : index
    %120 = vector.load %arg12[%c1_92, %c0_93] : memref<2x2048xf32, #tpu.memory_space<vmem>>, vector<1x256xf32>
    tpu.vector_store %arg12[%c1_92, %c0_93], %119 {strides = array<i32>} : memref<2x2048xf32, #tpu.memory_space<vmem>>, vector<1x256xf32>,
    %121 = vector.extract_strided_slice %116 {offsets = [1, 0], sizes = [1, 256], strides = [1, 1]} : vector<8x512xf32> to vector<1x256xf32>
    %c0_94 = arith.constant 0 : index
    %c256 = arith.constant 256 : index
    %122 = vector.load %arg12[%c0_94, %c256] : memref<2x2048xf32, #tpu.memory_space<vmem>>, vector<1x256xf32>
    tpu.vector_store %arg12[%c0_94, %c256], %121 {strides = array<i32>} : memref<2x2048xf32, #tpu.memory_space<vmem>>, vector<1x256xf32>,
    %123 = vector.extract_strided_slice %116 {offsets = [1, 256], sizes = [1, 256], strides = [1, 1]} : vector<8x512xf32> to vector<1x256xf32>
    %c1_95 = arith.constant 1 : index
    %c256_96 = arith.constant 256 : index
    %124 = vector.load %arg12[%c1_95, %c256_96] : memref<2x2048xf32, #tpu.memory_space<vmem>>, vector<1x256xf32>
    tpu.vector_store %arg12[%c1_95, %c256_96], %123 {strides = array<i32>} : memref<2x2048xf32, #tpu.memory_space<vmem>>, vector<1x256xf32>,
    %125 = vector.extract_strided_slice %116 {offsets = [2, 0], sizes = [1, 256], strides = [1, 1]} : vector<8x512xf32> to vector<1x256xf32>
    %c0_97 = arith.constant 0 : index
    %c512 = arith.constant 512 : index
    %126 = vector.load %arg12[%c0_97, %c512] : memref<2x2048xf32, #tpu.memory_space<vmem>>, vector<1x256xf32>
    tpu.vector_store %arg12[%c0_97, %c512], %125 {strides = array<i32>} : memref<2x2048xf32, #tpu.memory_space<vmem>>, vector<1x256xf32>,
    %127 = vector.extract_strided_slice %116 {offsets = [2, 256], sizes = [1, 256], strides = [1, 1]} : vector<8x512xf32> to vector<1x256xf32>
    %c1_98 = arith.constant 1 : index
    %c512_99 = arith.constant 512 : index
    %128 = vector.load %arg12[%c1_98, %c512_99] : memref<2x2048xf32, #tpu.memory_space<vmem>>, vector<1x256xf32>
    tpu.vector_store %arg12[%c1_98, %c512_99], %127 {strides = array<i32>} : memref<2x2048xf32, #tpu.memory_space<vmem>>, vector<1x256xf32>,
    %129 = vector.extract_strided_slice %116 {offsets = [3, 0], sizes = [1, 256], strides = [1, 1]} : vector<8x512xf32> to vector<1x256xf32>
    %c0_100 = arith.constant 0 : index
    %c768 = arith.constant 768 : index
    %130 = vector.load %arg12[%c0_100, %c768] : memref<2x2048xf32, #tpu.memory_space<vmem>>, vector<1x256xf32>
    tpu.vector_store %arg12[%c0_100, %c768], %129 {strides = array<i32>} : memref<2x2048xf32, #tpu.memory_space<vmem>>, vector<1x256xf32>,
    %131 = vector.extract_strided_slice %116 {offsets = [3, 256], sizes = [1, 256], strides = [1, 1]} : vector<8x512xf32> to vector<1x256xf32>
    %c1_101 = arith.constant 1 : index
    %c768_102 = arith.constant 768 : index
    %132 = vector.load %arg12[%c1_101, %c768_102] : memref<2x2048xf32, #tpu.memory_space<vmem>>, vector<1x256xf32>
    tpu.vector_store %arg12[%c1_101, %c768_102], %131 {strides = array<i32>} : memref<2x2048xf32, #tpu.memory_space<vmem>>, vector<1x256xf32>,
    %133 = vector.extract_strided_slice %116 {offsets = [4, 0], sizes = [1, 256], strides = [1, 1]} : vector<8x512xf32> to vector<1x256xf32>
    %c0_103 = arith.constant 0 : index
    %c1024 = arith.constant 1024 : index
    %134 = vector.load %arg12[%c0_103, %c1024] : memref<2x2048xf32, #tpu.memory_space<vmem>>, vector<1x256xf32>
    tpu.vector_store %arg12[%c0_103, %c1024], %133 {strides = array<i32>} : memref<2x2048xf32, #tpu.memory_space<vmem>>, vector<1x256xf32>,
    %135 = vector.extract_strided_slice %116 {offsets = [4, 256], sizes = [1, 256], strides = [1, 1]} : vector<8x512xf32> to vector<1x256xf32>
    %c1_104 = arith.constant 1 : index
    %c1024_105 = arith.constant 1024 : index
    %136 = vector.load %arg12[%c1_104, %c1024_105] : memref<2x2048xf32, #tpu.memory_space<vmem>>, vector<1x256xf32>
    tpu.vector_store %arg12[%c1_104, %c1024_105], %135 {strides = array<i32>} : memref<2x2048xf32, #tpu.memory_space<vmem>>, vector<1x256xf32>,
    %137 = vector.extract_strided_slice %116 {offsets = [5, 0], sizes = [1, 256], strides = [1, 1]} : vector<8x512xf32> to vector<1x256xf32>
    %c0_106 = arith.constant 0 : index
    %c1280 = arith.constant 1280 : index
    %138 = vector.load %arg12[%c0_106, %c1280] : memref<2x2048xf32, #tpu.memory_space<vmem>>, vector<1x256xf32>
    tpu.vector_store %arg12[%c0_106, %c1280], %137 {strides = array<i32>} : memref<2x2048xf32, #tpu.memory_space<vmem>>, vector<1x256xf32>,
    %139 = vector.extract_strided_slice %116 {offsets = [5, 256], sizes = [1, 256], strides = [1, 1]} : vector<8x512xf32> to vector<1x256xf32>
    %c1_107 = arith.constant 1 : index
    %c1280_108 = arith.constant 1280 : index
    %140 = vector.load %arg12[%c1_107, %c1280_108] : memref<2x2048xf32, #tpu.memory_space<vmem>>, vector<1x256xf32>
    tpu.vector_store %arg12[%c1_107, %c1280_108], %139 {strides = array<i32>} : memref<2x2048xf32, #tpu.memory_space<vmem>>, vector<1x256xf32>,
    %141 = vector.extract_strided_slice %116 {offsets = [6, 0], sizes = [1, 256], strides = [1, 1]} : vector<8x512xf32> to vector<1x256xf32>
    %c0_109 = arith.constant 0 : index
    %c1536 = arith.constant 1536 : index
    %142 = vector.load %arg12[%c0_109, %c1536] : memref<2x2048xf32, #tpu.memory_space<vmem>>, vector<1x256xf32>
    tpu.vector_store %arg12[%c0_109, %c1536], %141 {strides = array<i32>} : memref<2x2048xf32, #tpu.memory_space<vmem>>, vector<1x256xf32>,
    %143 = vector.extract_strided_slice %116 {offsets = [6, 256], sizes = [1, 256], strides = [1, 1]} : vector<8x512xf32> to vector<1x256xf32>
    %c1_110 = arith.constant 1 : index
    %c1536_111 = arith.constant 1536 : index
    %144 = vector.load %arg12[%c1_110, %c1536_111] : memref<2x2048xf32, #tpu.memory_space<vmem>>, vector<1x256xf32>
    tpu.vector_store %arg12[%c1_110, %c1536_111], %143 {strides = array<i32>} : memref<2x2048xf32, #tpu.memory_space<vmem>>, vector<1x256xf32>,
    %145 = vector.extract_strided_slice %116 {offsets = [7, 0], sizes = [1, 256], strides = [1, 1]} : vector<8x512xf32> to vector<1x256xf32>
    %c0_112 = arith.constant 0 : index
    %c1792 = arith.constant 1792 : index
    %146 = vector.load %arg12[%c0_112, %c1792] : memref<2x2048xf32, #tpu.memory_space<vmem>>, vector<1x256xf32>
    tpu.vector_store %arg12[%c0_112, %c1792], %145 {strides = array<i32>} : memref<2x2048xf32, #tpu.memory_space<vmem>>, vector<1x256xf32>,
    %147 = vector.extract_strided_slice %116 {offsets = [7, 256], sizes = [1, 256], strides = [1, 1]} : vector<8x512xf32> to vector<1x256xf32>
    %c1_113 = arith.constant 1 : index
    %c1792_114 = arith.constant 1792 : index
    %148 = vector.load %arg12[%c1_113, %c1792_114] : memref<2x2048xf32, #tpu.memory_space<vmem>>, vector<1x256xf32>
    tpu.vector_store %arg12[%c1_113, %c1792_114], %147 {strides = array<i32>} : memref<2x2048xf32, #tpu.memory_space<vmem>>, vector<1x256xf32>,
    %c0_115 = arith.constant 0 : index
    %c0_116 = arith.constant 0 : index
    %149 = vector.load %arg12[%c0_115, %c0_116] : memref<2x2048xf32, #tpu.memory_space<vmem>>, vector<2x2048xf32>
    %150 = arith.truncf %149 : vector<2x2048xf32> to vector<2x2048xbf16>
    %c0_117 = arith.constant 0 : index
    %c0_118 = arith.constant 0 : index
    %151 = vector.load %arg6[%c0_117, %c0_118] : memref<2048x128xbf16, #tpu.memory_space<vmem>>, vector<2048x128xbf16>
    %cst_119 = arith.constant dense<0.000000e+00> : vector<2x128xf32>
    %152 = tpu.matmul %150, %151, %cst_119 {dimension_numbers = #tpu.dot_dimension_numbers<[1], [0], [0], [1], [0, 0, 1, 1], [], []>} : vector<2x2048xbf16>, vector<2048x128xbf16>, vector<2x128xf32> -> vector<2x128xf32>
    %c0_120 = arith.constant 0 : index
    %c0_121 = arith.constant 0 : index
    %153 = vector.load %arg7[%c0_120, %c0_121] : memref<1x128xf32, #tpu.memory_space<vmem>>, vector<1x128xf32>
    %154 = vector.broadcast %153 : vector<1x128xf32> to vector<2x128xf32>
    %155 = arith.addf %152, %154 : vector<2x128xf32>
    %c0_122 = arith.constant 0 : index
    %c0_123 = arith.constant 0 : index
    %156 = vector.load %arg9[%c0_122, %c0_123] : memref<2x128xf32, #tpu.memory_space<vmem>>, vector<2x128xf32>
    tpu.vector_store %arg9[%c0_122, %c0_123], %155 {strides = array<i32>} : memref<2x128xf32, #tpu.memory_space<vmem>>, vector<2x128xf32>,
    return
  }
  func.func @transform_0(%arg0: i32) -> (i32, i32) {
    %c0_i32 = arith.constant 0 : i32
    %c0_i32_0 = arith.constant 0 : i32
    return %c0_i32, %arg0 : i32, i32
  }
  func.func @transform_1(%arg0: i32) -> (i32, i32) {
    %c0_i32 = arith.constant 0 : i32
    %c0_i32_0 = arith.constant 0 : i32
    %c0_i32_1 = arith.constant 0 : i32
    return %c0_i32, %c0_i32_0 : i32, i32
  }
  func.func @transform_2(%arg0: i32) -> (i32, i32) {
    %c0_i32 = arith.constant 0 : i32
    %c0_i32_0 = arith.constant 0 : i32
    %c0_i32_1 = arith.constant 0 : i32
    return %c0_i32, %c0_i32_0 : i32, i32
  }
  func.func @transform_3(%arg0: i32) -> (i32, i32) {
    %c0_i32 = arith.constant 0 : i32
    %c0_i32_0 = arith.constant 0 : i32
    %c0_i32_1 = arith.constant 0 : i32
    return %c0_i32, %c0_i32_0 : i32, i32
  }
  func.func @transform_4(%arg0: i32) -> (i32, i32) {
    %c0_i32 = arith.constant 0 : i32
    %c0_i32_0 = arith.constant 0 : i32
    %c0_i32_1 = arith.constant 0 : i32
    return %c0_i32, %c0_i32_0 : i32, i32
  }
  func.func @transform_5(%arg0: i32) -> (i32, i32) {
    %c0_i32 = arith.constant 0 : i32
    %c0_i32_0 = arith.constant 0 : i32
    %c0_i32_1 = arith.constant 0 : i32
    return %c0_i32, %c0_i32_0 : i32, i32
  }
  func.func @transform_6(%arg0: i32) -> (i32, i32) {
    %c0_i32 = arith.constant 0 : i32
    %c0_i32_0 = arith.constant 0 : i32
    %c0_i32_1 = arith.constant 0 : i32
    return %c0_i32, %c0_i32_0 : i32, i32
  }
  func.func @transform_7(%arg0: i32) -> (i32, i32, i32) {
    %c0_i32 = arith.constant 0 : i32
    %c0_i32_0 = arith.constant 0 : i32
    %c0_i32_1 = arith.constant 0 : i32
    %c0_i32_2 = arith.constant 0 : i32
    return %c0_i32, %c0_i32_0, %c0_i32_1 : i32, i32, i32
  }
  func.func @transform_8(%arg0: i32) -> (i32, i32) {
    %c0_i32 = arith.constant 0 : i32
    %c0_i32_0 = arith.constant 0 : i32
    return %arg0, %c0_i32 : i32, i32
  }
}

</mosaic_0001>

<bundles_post_ra>
// kernel: forward.1
= control target key start
LH: loop header
LB: loop body
LE: loop exit
PB: predicated region body
PF: predicated region fallthrough
CT: control target
= control target key end

     0   :  { %13 = vsyncpa [#allocation6], 0  ;;  %s3816_s0 = inlined_call_operand.vmem [shape: f32[4,512], index: 0, kind: input, shape index: {}]   ;;  %s3817_s1 = inlined_call_operand.vmem [shape: bf16[8,36], index: 1, kind: input, shape index: {}]   ;;  %s3818_s2 = inlined_call_operand.vmem [shape: f32[8,1], index: 2, kind: input, shape index: {}]   ;;  %s3819_s3 = inlined_call_operand.vmem [shape: bf16[8,72], index: 3, kind: input, shape index: {}]   ;;  %s3820_s4 = inlined_call_operand.vmem [shape: f32[8,1], index: 4, kind: input, shape index: {}]   ;;  %s3821_s5 = inlined_call_operand.hbm [shape: bf16[2048,128], index: 5, kind: input, shape index: {}]   ;;  %s3822_s6 = inlined_call_operand.vmem [shape: f32[1,128], index: 6, kind: input, shape index: {}]   ;;  %s3823_s7 = inlined_call_operand.vmem [shape: f32[9,1,512], index: 7, kind: input, shape index: {}]   ;;  %s3824_s8 = inlined_call_operand.hbm [shape: f32[2,128], index: 8, kind: output, shape index: {}]  }
   0x1   :  { %14 = vsyncpa [#allocation7], 0  ;;  %s3257_s27 = smov [#allocation5]  }
   0x2   :  { %s30_s28 = sshll.u32 %s3257_s27, 4  ;;  %s31_s28 = int_to_ptr.vmem [resolvable:$true] %s30_s28 }
   0x3   :  { %s3221_s29 = scalar_lea.vmem %s31_s28, 16384  ;;  %p3226_p1 = scmp.lt.s32.totalorder %s31_s28, %s31_s28 }
   0x4   :  { %p3222_p0 = scmp.ne.s32.totalorder %s31_s28, %s3221_s29  ;;  %p3227_p2 = scmp.lt.s32.totalorder %s3221_s29, %s3221_s29 }
   0x6   :  { %p3228_p3 = por %p3227_p2, %p3226_p1 }
   0x8   :  { %p3229_p4 = pnand %p3228_p3, %p3222_p0 }
   0xa   :  { %3232 = shalt.err (!%p3229_p4)
}
   0xb   :  { %s3258_s30 = smov 64   ;;  %s3259_s9 = smov 4  }
   0xc   :  { %36 = dma.hbm_to_vmem [thread:$0]  %s3821_s5, 16384, %s31_s28, [#allocation6], %s3258_s30, %s3258_s30, %s3259_s9  }
   0xd   :  { %3253 = dma.done.wait [#allocation6], 16384  }
   0xe   :  { %3254 = vsyncadd [#allocation6], 4294950912  ;;  %v46_v0 = vld [vmem:[%s3816_s0 + $0x8] sm:$0xff]  ;;  %v45_v1 = vld [vmem:[%s3816_s0] sm:$0xff]  ;;  %s3260_s16 = smov 111   ;;  %s3261_s5 = smov 127   ;;  %v61_v6 = vlaneseq }
   0xf   :  { %418 = vrot.lane.b32.xlu1 %v46_v0, %s3260_s16  ;;  %256 = vst [vmem:[#allocation2 + $0x28] sm:$0xf] %v46_v0  ;;  %414 = vrot.lane.b32.xlu0 %v45_v1, %s3260_s16  ;;  %254 = vst [vmem:[#allocation2 + $0x8] sm:$0xf] %v45_v1  ;;  %v50_v2 = vcombine.high %v46_v0, %v46_v0  ;;  %v49_v3 = vcombine.high %v45_v1, %v45_v1  ;;  %s3262_s0 = smov 112   ;;  %s3263_s17 = smov 113  }
  0x10   :  { %s3264_s18 = smov 16   ;;  %s3265_s19 = smov 1   ;;  %v3268_v4 = vmov 0   ;;  %v491_v5 = vld [vmem:[%s3818_s2] sm:$0xff]  ;;  %v3365_v7 = vshrl.u32 %v61_v6, 7  ;;  %v3368_v8 = vand.u32 127, %v61_v6 }
  0x11   :  { %257 = vst [vmem:[#allocation2 + $0x40] sm:$0xf] %v50_v2  ;;  %255 = vst [vmem:[#allocation2 + $0x88] sm:$0xf] %v49_v3  ;;  %s3266_s20 = smov 17   ;;  %s3267_s21 = smov 15   ;;  %546 = vmatprep.mubr.bf16.mxu0 %v3268_v4  ;;  %587 = vmatprep.mubr.bf16.mxu1 %v3268_v4 }
  0x12   :  { %3078 = vset.pattern.permute.xlu0 %v3268_v4  ;;  %v3371_v9 = vsub.s32 2, %v3365_v7  ;;  %v3374_v10 = vsub.s32 3, %v3365_v7  ;;  %v2742_v11 = vld [vmem:[%s3823_s7 + $0x20] sm:$0xf]  ;;  %v3380_v14 = vsub.s32 0, %v3365_v7  ;;  %v3383_v15 = vsub.s32 1, %v3365_v7 }
  0x13   :  { %420 = vrot.lane.b32.xlu1 %v50_v2, %s3260_s16  ;;  %258 = vrot.lane.b32.xlu0 %v45_v1, %s3261_s5  ;;  %vm422_vm0 = vcmp.lt.s32.totalorder %v3368_v8, 111  ;;  %v2739_v18 = vld [vmem:[%s3823_s7 + $0x14] sm:$0xf]  ;;  %vm266_vm1 = vcmp.lt.s32.totalorder %v3368_v8, 127  ;;  %v2741_v39 = vld [vmem:[%s3823_s7 + $0x1c] sm:$0xf] }
  0x14   :  { %v441_v16 = vrot.slane %v2742_v11, %v3371_v9  ;;  %v445_v17 = vrot.slane %v2742_v11, %v3374_v10  ;;  %v277_v23 = vrot.slane %v2739_v18, %v3380_v14  ;;  %v433_v26 = vrot.slane %v2742_v11, %v3380_v14 }
  0x15   :  { %v437_v27 = vrot.slane %v2742_v11, %v3383_v15  ;;  %v289_v30 = vrot.slane %v2739_v18, %v3374_v10  ;;  %v281_v34 = vrot.slane %v2739_v18, %v3383_v15  ;;  %v285_v38 = vrot.slane %v2739_v18, %v3371_v9 }
  0x16   :  { %vm366_vm2 = vcmp.lt.s32.totalorder %v3368_v8, 112  ;;  %v377_v49 = vrot.slane %v2741_v39, %v3380_v14  ;;  %vm501_vm3 = vcmask 1041408   ;;  %v389_v61 = vrot.slane %v2741_v39, %v3374_v10 }
  0x17   :  { %260 = vrot.lane.b32.xlu1 %v49_v3, %s3261_s5  ;;  %416 = vrot.lane.b32.xlu0 %v49_v3, %s3260_s16  ;;  %v381_v62 = vrot.slane %v2741_v39, %v3383_v15  ;;  %v385_v63 = vrot.slane %v2741_v39, %v3371_v9  ;;  %vm322_vm4 = vcmp.lt.s32.totalorder %v3368_v8, 113  ;;  %vm106_vm5 = vcmp.lt.s32.totalorder %v3368_v8, 16 }
  0x18   :  { %vm206_vm6 = vcmp.lt.s32.totalorder %v3368_v8, 1  ;;  %vm63_vm7 = vcmp.lt.s32.totalorder %v3368_v8, 17  ;;  %vm162_vm8 = vcmp.lt.s32.totalorder %v3368_v8, 15  ;;  %vm497_vm9 = vcmask 293888   ;;  %v3083_v8 = vld [vmem:[#allocation5 + $0xf8] sm:$0xff]  }
  0x19   :  { %vm1007_vm10 = vcmask 1043456   ;;  %vm1003_vm11 = vcmask 588800   ;;  %vm3727_vm12 = vcmp.lt.s32.totalorder %v61_v6, 256 }
  0x1b   :  { %264 = vrot.lane.b32.xlu1 %v50_v2, %s3261_s5  ;;  %262 = vrot.lane.b32.xlu0 %v46_v0, %s3261_s5 }
  0x1f   :  { %360 = vrot.lane.b32.xlu1 %v49_v3, %s3262_s0  ;;  %358 = vrot.lane.b32.xlu0 %v45_v1, %s3262_s0 }
  0x23   :  { %364 = vrot.lane.b32.xlu1 %v50_v2, %s3262_s0  ;;  %362 = vrot.lane.b32.xlu0 %v46_v0, %s3262_s0 }
  0x27   :  { %316 = vrot.lane.b32.xlu1 %v49_v3, %s3263_s17  ;;  %314 = vrot.lane.b32.xlu0 %v45_v1, %s3263_s17 }
  0x2b   :  { %320 = vrot.lane.b32.xlu1 %v50_v2, %s3263_s17  ;;  %318 = vrot.lane.b32.xlu0 %v46_v0, %s3263_s17 }
  0x2f   :  { %100 = vrot.lane.b32.xlu1 %v49_v3, %s3264_s18  ;;  %98 = vrot.lane.b32.xlu0 %v45_v1, %s3264_s18 }
  0x33   :  { %104 = vrot.lane.b32.xlu1 %v50_v2, %s3264_s18  ;;  %102 = vrot.lane.b32.xlu0 %v46_v0, %s3264_s18 }
  0x37   :  { %200 = vrot.lane.b32.xlu1 %v49_v3, %s3265_s19  ;;  %198 = vrot.lane.b32.xlu0 %v45_v1, %s3265_s19 }
  0x3b   :  { %204 = vrot.lane.b32.xlu1 %v50_v2, %s3265_s19  ;;  %202 = vrot.lane.b32.xlu0 %v46_v0, %s3265_s19 }
  0x3f   :  { %55 = vrot.lane.b32.xlu1 %v49_v3, %s3266_s20  ;;  %53 = vrot.lane.b32.xlu0 %v45_v1, %s3266_s20 }
  0x43   :  { %59 = vrot.lane.b32.xlu1 %v50_v2, %s3266_s20  ;;  %57 = vrot.lane.b32.xlu0 %v46_v0, %s3266_s20 }
  0x47   :  { %156 = vrot.lane.b32.xlu1 %v49_v3, %s3267_s21  ;;  %154 = vrot.lane.b32.xlu0 %v45_v1, %s3267_s21 }
  0x4b   :  { %160 = vrot.lane.b32.xlu1 %v50_v2, %s3267_s21  ;;  %158 = vrot.lane.b32.xlu0 %v46_v0, %s3267_s21  ;;  %v2740_v0 = vld [vmem:[%s3823_s7 + $0x18] sm:$0xf] }
  0x4f   :  { %494 = vperm.xlu0 %3078, %v491_v5  }
  0x81   :  { %v419_v12 = vpop.permute.xlu1 %418  ;;  %v415_v13 = vpop.permute.xlu0 %414 }
  0x85   :  { %v421_v19 = vpop.permute.xlu1 %420  ;;  %v259_v20 = vpop.permute.xlu0 %258 }
  0x86   :  { %v423_v21 = vsel %vm422_vm0, %v419_v12, %v421_v19  ;;  %v426_v22 = vsel %vm422_vm0, %v421_v19, %v415_v13 }
  0x87   :  { %v452_v24 = vmul.f32 %v441_v16, %v423_v21  ;;  %v453_v25 = vmul.f32 %v445_v17, %v426_v22 }
  0x89   :  { %456 = vst [vmem:[#allocation2 + $0x70] sm:$0xf] %v452_v24  ;;  %457 = vst [vmem:[#allocation2 + $0x90] sm:$0xf] %v453_v25  ;;  %v261_v28 = vpop.permute.xlu1 %260  ;;  %v417_v29 = vpop.permute.xlu0 %416 }
  0x8a   :  { %v269_v31 = vsel %vm266_vm1, %v259_v20, %v261_v28  ;;  %v424_v32 = vsel %vm422_vm0, %v417_v29, %v419_v12  ;;  %v425_v33 = vsel %vm422_vm0, %v415_v13, %v417_v29 }
  0x8b   :  { %v294_v35 = vmul.f32 %v277_v23, %v269_v31  ;;  %v450_v36 = vmul.f32 %v433_v26, %v425_v33  ;;  %v451_v37 = vmul.f32 %v437_v27, %v424_v32  ;;  %v345_v32 = vrot.slane %v2740_v0, %v3374_v10 }
  0x8c   :  { %v337_v33 = vrot.slane %v2740_v0, %v3383_v15 }
  0x8d   :  { %v302_v40 = vrot.slane %v294_v35, 4  ;;  %454 = vst [vmem:[#allocation2 + $0x20] sm:$0xf] %v450_v36  ;;  %455 = vst [vmem:[#allocation2 + $0x48] sm:$0xf] %v451_v37  ;;  %v265_v41 = vpop.permute.xlu1 %264  ;;  %v263_v42 = vpop.permute.xlu0 %262 }
  0x8e   :  { %v270_v43 = vsel %vm266_vm1, %v265_v41, %v259_v20  ;;  %v267_v44 = vsel %vm266_vm1, %v263_v42, %v265_v41  ;;  %v268_v45 = vsel %vm266_vm1, %v261_v28, %v263_v42  ;;  %v333_v20 = vrot.slane %v2740_v0, %v3380_v14  ;;  %v2736_v35 = vld [vmem:[%s3823_s7 + $0x4] sm:$0xf] }
  0x8f   :  { %310 = vst [vmem:[#allocation2 + $0x8] sm:$0xf0] %v302_v40  ;;  %v297_v46 = vmul.f32 %v289_v30, %v270_v43  ;;  %v295_v47 = vmul.f32 %v281_v34, %v268_v45  ;;  %v296_v48 = vmul.f32 %v285_v38, %v267_v44  ;;  %v341_v34 = vrot.slane %v2740_v0, %v3371_v9 }
  0x90   :  { %v478_v50 = vld [vmem:[#allocation2 + $0x90] sm:$0xf]  ;;  %v121_v44 = vrot.slane %v2736_v35, %v3383_v15 }
  0x91   :  { %v477_v51 = vld [vmem:[#allocation2 + $0x70] sm:$0xf]  ;;  %v305_v52 = vrot.slane %v297_v46, 4  ;;  %v303_v53 = vrot.slane %v295_v47, 4  ;;  %v304_v54 = vrot.slane %v296_v48, 4  ;;  %v361_v55 = vpop.permute.xlu1 %360  ;;  %v359_v56 = vpop.permute.xlu0 %358  ;;  %v490_v57 = vpack.c.bf16 %v478_v50, %v478_v50 }
  0x92   :  { %v369_v58 = vsel %vm366_vm2, %v359_v56, %v361_v55  ;;  %v489_v59 = vpack.c.bf16 %v477_v51, %v477_v51  ;;  %v125_v50 = vrot.slane %v2736_v35, %v3371_v9  ;;  %v129_v51 = vrot.slane %v2736_v35, %v3374_v10 }
  0x93   :  { %313 = vst [vmem:[#allocation2 + $0x40] sm:$0xf0] %v305_v52  ;;  %311 = vst [vmem:[#allocation2 + $0x88] sm:$0xf0] %v303_v53  ;;  %v394_v60 = vmul.f32 %v377_v49, %v369_v58  ;;  %2745 = vmatprep.subr.msk.bf16.mxu1 %vm501_vm3, %v490_v57  ;;  %v117_v49 = vrot.slane %v2736_v35, %v3380_v14  ;;  %v2738_v52 = vld [vmem:[%s3823_s7 + $0xc] sm:$0xf] }
  0x94   :  { %312 = vst [vmem:[#allocation2 + $0x28] sm:$0xf0] %v304_v54  ;;  %v509_v1 = vsel %vm501_vm3, %v489_v59, 0  ;;  %v476_v2 = vld [vmem:[#allocation2 + $0x48] sm:$0xf] }
  0x95   :  { %v475_v3 = vld [vmem:[#allocation2 + $0x20] sm:$0xf]  ;;  %v402_v5 = vrot.slane %v394_v60, 4  ;;  %566 = vmatpush1.bf16.msra.mxu1 %v509_v1  ;;  %v365_v11 = vpop.permute.xlu1 %364  ;;  %v363_v12 = vpop.permute.xlu0 %362  ;;  %v488_v13 = vpack.c.bf16 %v476_v2, %v476_v2 }
  0x96   :  { %v487_v16 = vpack.c.bf16 %v475_v3, %v475_v3  ;;  %v370_v17 = vsel %vm366_vm2, %v365_v11, %v359_v56  ;;  %v367_v18 = vsel %vm366_vm2, %v363_v12, %v365_v11  ;;  %v368_v19 = vsel %vm366_vm2, %v361_v55, %v363_v12 }
  0x97   :  { %410 = vst [vmem:[#allocation2 + $0x58] sm:$0xf0] %v402_v5  ;;  %v397_v21 = vmul.f32 %v389_v61, %v370_v17  ;;  %v395_v22 = vmul.f32 %v381_v62, %v368_v19  ;;  %v396_v23 = vmul.f32 %v385_v63, %v367_v18  ;;  %2743 = vmatprep.subr.msk.bf16.mxu0 %vm501_vm3, %v488_v13  ;;  %v467_v19 = vld [vmem:[#allocation2 + $0x8] sm:$0xff] }
  0x98   :  { %v503_v24 = vsel %vm501_vm3, %v487_v16, 0  ;;  %v221_v62 = vrot.slane %v2738_v52, %v3383_v15 }
  0x99   :  { %525 = vmatpush1.bf16.msra.mxu0 %v503_v24  ;;  %v405_v25 = vrot.slane %v397_v21, 4  ;;  %v403_v26 = vrot.slane %v395_v22, 4  ;;  %v404_v27 = vrot.slane %v396_v23, 4  ;;  %v317_v28 = vpop.permute.xlu1 %316  ;;  %v315_v29 = vpop.permute.xlu0 %314 }
  0x9a   :  { %v325_v30 = vsel %vm322_vm4, %v315_v29, %v317_v28  ;;  %v468_v63 = vld [vmem:[#allocation2 + $0x88] sm:$0xff]  ;;  %v470_v18 = vld [vmem:[#allocation2 + $0x40] sm:$0xff] }
  0x9b   :  { %413 = vst [vmem:[#allocation2 + $0x60] sm:$0xf0] %v405_v25  ;;  %411 = vst [vmem:[#allocation2 + $0x10] sm:$0xf0] %v403_v26  ;;  %v350_v31 = vmul.f32 %v333_v20, %v325_v30  ;;  %v469_v20 = vld [vmem:[#allocation2 + $0x28] sm:$0xff]  ;;  %v217_v26 = vrot.slane %v2738_v52, %v3380_v14 }
  0x9c   :  { %412 = vst [vmem:[#allocation2 + $0x98] sm:$0xf0] %v404_v27  ;;  %v225_v27 = vrot.slane %v2738_v52, %v3371_v9 }
  0x9d   :  { %354 = vst [vmem:[#allocation2 + $0x58] sm:$0xf] %v350_v31  ;;  %v321_v36 = vpop.permute.xlu1 %320  ;;  %v319_v37 = vpop.permute.xlu0 %318 }
  0x9e   :  { %v326_v38 = vsel %vm322_vm4, %v321_v36, %v315_v29  ;;  %v323_v39 = vsel %vm322_vm4, %v319_v37, %v321_v36  ;;  %v324_v40 = vsel %vm322_vm4, %v317_v28, %v319_v37  ;;  %v229_v28 = vrot.slane %v2738_v52, %v3374_v10  ;;  %v68_v29 = vld [vmem:[%s3823_s7] sm:$0xf] }
  0x9f   :  { %v353_v41 = vmul.f32 %v345_v32, %v326_v38  ;;  %v351_v42 = vmul.f32 %v337_v33, %v324_v40  ;;  %v352_v43 = vmul.f32 %v341_v34, %v323_v39  ;;  %v77_v39 = vrot.slane %v68_v29, %v3383_v15 }
  0xa1   :  { %357 = vst [vmem:[#allocation2 + $0x60] sm:$0xf] %v353_v41  ;;  %355 = vst [vmem:[#allocation2 + $0x10] sm:$0xf] %v351_v42  ;;  %v101_v45 = vpop.permute.xlu1 %100  ;;  %v99_v46 = vpop.permute.xlu0 %98 }
  0xa2   :  { %356 = vst [vmem:[#allocation2 + $0x98] sm:$0xf] %v352_v43  ;;  %v109_v47 = vsel %vm106_vm5, %v99_v46, %v101_v45 }
  0xa3   :  { %v135_v48 = vmul.f32 %v121_v44, %v109_v47  ;;  %v73_v47 = vrot.slane %v68_v29, %v3380_v14 }
  0xa4   :  { %v471_v0 = vld [vmem:[#allocation2 + $0x58] sm:$0xff] }
  0xa5   :  { %v143_v53 = vrot.slane %v135_v48, 4  ;;  %v105_v54 = vpop.permute.xlu1 %104  ;;  %v103_v55 = vpop.permute.xlu0 %102  ;;  %v483_v23 = vpack.c.bf16 %v471_v0, %v467_v19  ;;  %v81_v48 = vrot.slane %v68_v29, %v3371_v9 }
  0xa6   :  { %v110_v56 = vsel %vm106_vm5, %v105_v54, %v99_v46  ;;  %v107_v57 = vsel %vm106_vm5, %v103_v55, %v105_v54  ;;  %v108_v58 = vsel %vm106_vm5, %v101_v45, %v103_v55 }
  0xa7   :  { %151 = vst [vmem:[#allocation2 + $0x38] sm:$0xf0] %v143_v53  ;;  %v134_v59 = vmul.f32 %v117_v49, %v110_v56  ;;  %v136_v60 = vmul.f32 %v125_v50, %v108_v58  ;;  %v137_v61 = vmul.f32 %v129_v51, %v107_v57  ;;  %v85_v49 = vrot.slane %v68_v29, %v3374_v10  ;;  %v2737_v50 = vld [vmem:[%s3823_s7 + $0x8] sm:$0xf] }
  0xa8   :  { %v472_v1 = vld [vmem:[#allocation2 + $0x10] sm:$0xff]  ;;  %v474_v2 = vld [vmem:[#allocation2 + $0x60] sm:$0xff]  ;;  %v173_v0 = vrot.slane %v2737_v50, %v3380_v14 }
  0xa9   :  { %v473_v3 = vld [vmem:[#allocation2 + $0x98] sm:$0xff]  ;;  %v142_v5 = vrot.slane %v134_v59, 4  ;;  %v144_v11 = vrot.slane %v136_v60, 4  ;;  %v145_v12 = vrot.slane %v137_v61, 4  ;;  %v201_v13 = vpop.permute.xlu1 %200  ;;  %v199_v16 = vpop.permute.xlu0 %198  ;;  %v484_v17 = vpack.c.bf16 %v472_v1, %v468_v63 }
  0xaa   :  { %v209_v21 = vsel %vm206_vm6, %v199_v16, %v201_v13  ;;  %v486_v22 = vpack.c.bf16 %v474_v2, %v470_v18  ;;  %v485_v24 = vpack.c.bf16 %v473_v3, %v469_v20  ;;  %v177_v59 = vrot.slane %v2737_v50, %v3383_v15 }
  0xab   :  { %150 = vst [vmem:[#allocation2] sm:$0xf0] %v142_v5  ;;  %152 = vst [vmem:[#allocation2 + $0x50] sm:$0xf0] %v144_v11  ;;  %v235_v25 = vmul.f32 %v221_v62, %v209_v21  ;;  %526 = vmatprep.subr.bf16.mxu0 %v484_v17  ;;  %v181_v1 = vrot.slane %v2737_v50, %v3371_v9  ;;  %v185_v2 = vrot.slane %v2737_v50, %v3374_v10 }
  0xac   :  { %153 = vst [vmem:[#allocation2 + $0x18] sm:$0xf0] %v145_v12  ;;  %567 = vmatprep.subr.bf16.mxu1 %v486_v22  ;;  %527 = vmatpush1.bf16.msra.mxu0 %v483_v23 }
  0xad   :  { %v243_v30 = vrot.slane %v235_v25, 4  ;;  %568 = vmatpush1.bf16.msra.mxu1 %v485_v24  ;;  %v205_v31 = vpop.permute.xlu1 %204  ;;  %v203_v32 = vpop.permute.xlu0 %202 }
  0xae   :  { %v210_v33 = vsel %vm206_vm6, %v205_v31, %v199_v16  ;;  %v207_v34 = vsel %vm206_vm6, %v203_v32, %v205_v31  ;;  %v208_v35 = vsel %vm206_vm6, %v201_v13, %v203_v32  ;;  %v458_v31 = vld [vmem:[%s3817_s1] sm:$0xf] }
  0xaf   :  { %251 = vst [vmem:[#allocation2 + $0x68] sm:$0xf0] %v243_v30  ;;  %v234_v36 = vmul.f32 %v217_v26, %v210_v33  ;;  %v236_v37 = vmul.f32 %v225_v27, %v208_v35  ;;  %v237_v38 = vmul.f32 %v229_v28, %v207_v34 }
  0xb1   :  { %v242_v40 = vrot.slane %v234_v36, 4  ;;  %v244_v41 = vrot.slane %v236_v37, 4  ;;  %v245_v42 = vrot.slane %v237_v38, 4  ;;  %v56_v43 = vpop.permute.xlu1 %55  ;;  %v54_v44 = vpop.permute.xlu0 %53 }
  0xb2   :  { %v66_v45 = vsel %vm63_vm7, %v54_v44, %v56_v43 }
  0xb3   :  { %250 = vst [vmem:[#allocation2 + $0x30] sm:$0xf0] %v242_v40  ;;  %252 = vst [vmem:[#allocation2 + $0x78] sm:$0xf0] %v244_v41  ;;  %v91_v46 = vmul.f32 %v77_v39, %v66_v45 }
  0xb4   :  { %253 = vst [vmem:[#allocation2 + $0x80] sm:$0xf0] %v245_v42 }
  0xb5   :  { %95 = vst [vmem:[#allocation2 + $0x38] sm:$0xf] %v91_v46  ;;  %v60_v51 = vpop.permute.xlu1 %59  ;;  %v58_v52 = vpop.permute.xlu0 %57 }
  0xb6   :  { %v67_v53 = vsel %vm63_vm7, %v60_v51, %v54_v44  ;;  %v64_v54 = vsel %vm63_vm7, %v58_v52, %v60_v51  ;;  %v65_v55 = vsel %vm63_vm7, %v56_v43, %v58_v52 }
  0xb7   :  { %v90_v56 = vmul.f32 %v73_v47, %v67_v53  ;;  %v92_v57 = vmul.f32 %v81_v48, %v65_v55  ;;  %v93_v58 = vmul.f32 %v85_v49, %v64_v54  ;;  %v997_v48 = vld [vmem:[%s3820_s4] sm:$0xff] }
  0xb8   :  { %v2753_v49 = vld [vmem:[%s3823_s7 + $0x20] sm:$0xf] }
  0xb9   :  { %94 = vst [vmem:[#allocation2] sm:$0xf] %v90_v56  ;;  %96 = vst [vmem:[#allocation2 + $0x50] sm:$0xf] %v92_v57  ;;  %v157_v60 = vpop.permute.xlu1 %156  ;;  %v155_v61 = vpop.permute.xlu0 %154  ;;  %v915_v52 = vrot.slane %v2753_v49, %v3380_v14  ;;  %v919_v53 = vrot.slane %v2753_v49, %v3383_v15 }
  0xba   :  { %97 = vst [vmem:[#allocation2 + $0x18] sm:$0xf] %v93_v58  ;;  %v165_v62 = vsel %vm162_vm8, %v155_v61, %v157_v60 }
  0xbb   :  { %v191_v63 = vmul.f32 %v177_v59, %v165_v62 }
  0xbc   :  { %v460_v19 = vld [vmem:[#allocation2 + $0x38] sm:$0xff] }
  0xbd   :  { %195 = vst [vmem:[#allocation2 + $0x68] sm:$0xf] %v191_v63  ;;  %v161_v3 = vpop.permute.xlu1 %160  ;;  %v159_v5 = vpop.permute.xlu0 %158 }
  0xbe   :  { %v166_v11 = vsel %vm162_vm8, %v161_v3, %v155_v61  ;;  %v163_v12 = vsel %vm162_vm8, %v159_v5, %v161_v3  ;;  %v164_v13 = vsel %vm162_vm8, %v157_v60, %v159_v5  ;;  %v923_v60 = vrot.slane %v2753_v49, %v3371_v9 }
  0xbf   :  { %v190_v16 = vmul.f32 %v173_v0, %v166_v11  ;;  %v192_v17 = vmul.f32 %v181_v1, %v164_v13  ;;  %v193_v18 = vmul.f32 %v185_v2, %v163_v12  ;;  %v927_v61 = vrot.slane %v2753_v49, %v3374_v10 }
  0xc0   :  { %v459_v22 = vld [vmem:[#allocation2] sm:$0xff]  ;;  %v461_v24 = vld [vmem:[#allocation2 + $0x50] sm:$0xff] }
  0xc1   :  { %194 = vst [vmem:[#allocation2 + $0x30] sm:$0xf] %v190_v16  ;;  %196 = vst [vmem:[#allocation2 + $0x78] sm:$0xf] %v192_v17  ;;  %v462_v23 = vld [vmem:[#allocation2 + $0x18] sm:$0xff] }
  0xc2   :  { %197 = vst [vmem:[#allocation2 + $0x80] sm:$0xf] %v193_v18 }
  0xc4   :  { %v464_v20 = vld [vmem:[#allocation2 + $0x68] sm:$0xff] }
  0xc5   :  { %v480_v21 = vpack.c.bf16 %v464_v20, %v460_v19  ;;  %v2751_v20 = vld [vmem:[%s3823_s7 + $0x18] sm:$0xf] }
  0xc7   :  { %528 = vmatprep.subr.bf16.mxu0 %v480_v21  ;;  %v2752_v21 = vld [vmem:[%s3823_s7 + $0x1c] sm:$0xf] }
  0xc8   :  { %v463_v25 = vld [vmem:[#allocation2 + $0x30] sm:$0xff]  ;;  %v465_v27 = vld [vmem:[#allocation2 + $0x78] sm:$0xff] }
  0xc9   :  { %v466_v26 = vld [vmem:[#allocation2 + $0x80] sm:$0xff]  ;;  %v479_v28 = vpack.c.bf16 %v463_v25, %v459_v22  ;;  %v481_v30 = vpack.c.bf16 %v465_v27, %v461_v24  ;;  %v831_v24 = vrot.slane %v2751_v20, %v3380_v14  ;;  %v835_v25 = vrot.slane %v2751_v20, %v3383_v15 }
  0xca   :  { %v482_v29 = vpack.c.bf16 %v466_v26, %v462_v23  ;;  %v495_v32 = vpop.permute.xlu0 %494  ;;  %v873_v26 = vrot.slane %v2752_v21, %v3380_v14  ;;  %v877_v27 = vrot.slane %v2752_v21, %v3383_v15 }
  0xcb   :  { %529 = vmatpush1.bf16.msra.mxu0 %v479_v28 }
  0xcc   :  { %569 = vmatprep.subr.bf16.mxu1 %v482_v29 }
  0xcd   :  { %570 = vmatpush1.bf16.msra.mxu1 %v481_v30  ;;  %v839_v30 = vrot.slane %v2751_v20, %v3371_v9 }
  0xce   :  { %2744 = vmatmul.mubr.msk.bf16.vlgmr.msra.gmra.mxu0 %vm497_vm9, %v458_v31 }
  0xcf   :  { %1052 = vmatprep.mubr.bf16.mxu0 %v3268_v4 }
  0xd0   :  { %2746 = vmatmul.mubr.msk.bf16.vlgmr.msra.gmra.mxu1 %vm497_vm9, %v458_v31  ;;  %v843_v31 = vrot.slane %v2751_v20, %v3374_v10 }
  0xd1   :  { %1093 = vmatprep.mubr.bf16.mxu1 %v3268_v4 }
 0x18e   :  { %v548_v33 = vpop.f32.mrf.mxu0 }
 0x18f   :  { %v549_v34 = vadd.f32 %v548_v33, %v495_v32 }
 0x190   :  { %v589_v35 = vpop.f32.mrf.mxu1  ;;  %v550_v37 = vpop.f32.mrf.mxu0 }
 0x191   :  { %v590_v36 = vadd.f32 %v589_v35, %v495_v32  ;;  %v3519_v38 = vmax.f32 %v549_v34, 0.0  ;;  %v551_v39 = vadd.f32 %v550_v37, %v495_v32  ;;  %v885_v37 = vrot.slane %v2752_v21, %v3374_v10 }
 0x192   :  { %v591_v40 = vpop.f32.mrf.mxu1  ;;  %v552_v42 = vpop.f32.mrf.mxu0 }
 0x193   :  { %v3521_v41 = vmax.f32 %v590_v36, 0.0  ;;  %898 = vrot.lane.b32.xlu1 %v3519_v38, %s3260_s16  ;;  %v3527_v44 = vmax.f32 %v551_v39, 0.0  ;;  %v592_v45 = vadd.f32 %v591_v40, %v495_v32  ;;  %v881_v36 = vrot.slane %v2752_v21, %v3371_v9 }
 0x194   :  { %v593_v43 = vpop.f32.mrf.mxu1  ;;  %v553_v4 = vpop.f32.mrf.mxu0 }
 0x195   :  { %902 = vrot.lane.b32.xlu0 %v3521_v41, %s3260_s16  ;;  %v3533_v47 = vmax.f32 %v592_v45, 0.0  ;;  %v2750_v4 = vld [vmem:[%s3823_s7 + $0x14] sm:$0xf] }
 0x196   :  { %v594_v46 = vpop.f32.mrf.mxu1 }
 0x197   :  { %900 = vrot.lane.b32.xlu1 %v3527_v44, %s3260_s16 }
 0x199   :  { %814 = vrot.lane.b32.xlu0 %v3519_v38, %s3263_s17 }
 0x19b   :  { %904 = vrot.lane.b32.xlu1 %v3533_v47, %s3260_s16 }
 0x19d   :  { %818 = vrot.lane.b32.xlu0 %v3521_v41, %s3263_s17 }
 0x19f   :  { %816 = vrot.lane.b32.xlu1 %v3527_v44, %s3263_s17 }
 0x1a1   :  { %856 = vrot.lane.b32.xlu0 %v3519_v38, %s3262_s0 }
 0x1a3   :  { %820 = vrot.lane.b32.xlu1 %v3533_v47, %s3263_s17 }
 0x1a5   :  { %860 = vrot.lane.b32.xlu0 %v3521_v41, %s3262_s0 }
 0x1a7   :  { %858 = vrot.lane.b32.xlu1 %v3527_v44, %s3262_s0 }
 0x1a9   :  { %772 = vrot.lane.b32.xlu0 %v3519_v38, %s3261_s5 }
 0x1ab   :  { %862 = vrot.lane.b32.xlu1 %v3533_v47, %s3262_s0 }
 0x1ad   :  { %776 = vrot.lane.b32.xlu0 %v3521_v41, %s3261_s5 }
 0x1af   :  { %774 = vrot.lane.b32.xlu1 %v3527_v44, %s3261_s5 }
 0x1b1   :  { %684 = vrot.lane.b32.xlu0 %v3519_v38, %s3267_s21 }
 0x1b3   :  { %778 = vrot.lane.b32.xlu1 %v3533_v47, %s3261_s5 }
 0x1b5   :  { %688 = vrot.lane.b32.xlu0 %v3521_v41, %s3267_s21 }
 0x1b7   :  { %686 = vrot.lane.b32.xlu1 %v3527_v44, %s3267_s21 }
 0x1b9   :  { %726 = vrot.lane.b32.xlu0 %v3519_v38, %s3265_s19 }
 0x1bb   :  { %690 = vrot.lane.b32.xlu1 %v3533_v47, %s3267_s21 }
 0x1bd   :  { %730 = vrot.lane.b32.xlu0 %v3521_v41, %s3265_s19 }
 0x1bf   :  { %728 = vrot.lane.b32.xlu1 %v3527_v44, %s3265_s19 }
 0x1c1   :  { %600 = vrot.lane.b32.xlu0 %v3519_v38, %s3266_s20 }
 0x1c3   :  { %732 = vrot.lane.b32.xlu1 %v3533_v47, %s3265_s19 }
 0x1c5   :  { %604 = vrot.lane.b32.xlu0 %v3521_v41, %s3266_s20 }
 0x1c7   :  { %602 = vrot.lane.b32.xlu1 %v3527_v44, %s3266_s20 }
 0x1c9   :  { %642 = vrot.lane.b32.xlu0 %v3519_v38, %s3264_s18 }
 0x1cb   :  { %606 = vrot.lane.b32.xlu1 %v3533_v47, %s3266_s20 }
 0x1cd   :  { %646 = vrot.lane.b32.xlu0 %v3521_v41, %s3264_s18 }
 0x1cf   :  { %644 = vrot.lane.b32.xlu1 %v3527_v44, %s3264_s18 }
 0x1d1   :  { %1000 = vperm.xlu0 %3078, %v997_v48  }
 0x1d3   :  { %648 = vrot.lane.b32.xlu1 %v3533_v47, %s3264_s18 }
 0x205   :  { %v899_v50 = vpop.permute.xlu1 %898 }
 0x207   :  { %v903_v51 = vpop.permute.xlu0 %902 }
 0x209   :  { %v901_v54 = vpop.permute.xlu1 %900 }
 0x20a   :  { %v907_v55 = vsel %vm422_vm0, %v901_v54, %v903_v51  ;;  %v908_v56 = vsel %vm422_vm0, %v899_v50, %v901_v54  ;;  %v789_v54 = vrot.slane %v2750_v4, %v3380_v14 }
 0x20b   :  { %v815_v57 = vpop.permute.xlu0 %814  ;;  %v932_v58 = vmul.f32 %v915_v52, %v908_v56  ;;  %v933_v59 = vmul.f32 %v919_v53, %v907_v55  ;;  %v793_v55 = vrot.slane %v2750_v4, %v3383_v15 }
 0x20d   :  { %v993_v62 = vpack.c.bf16 %v932_v58, %v932_v58  ;;  %v994_v63 = vpack.c.bf16 %v933_v59, %v933_v59  ;;  %v905_v0 = vpop.permute.xlu1 %904 }
 0x20e   :  { %v906_v1 = vsel %vm422_vm0, %v903_v51, %v905_v0  ;;  %v909_v2 = vsel %vm422_vm0, %v905_v0, %v899_v50 }
 0x20f   :  { %v819_v3 = vpop.permute.xlu0 %818  ;;  %v934_v5 = vmul.f32 %v923_v60, %v906_v1  ;;  %v935_v11 = vmul.f32 %v927_v61, %v909_v2  ;;  %2754 = vmatprep.subr.msk.bf16.mxu0 %vm1007_vm10, %v994_v63  ;;  %v1009_v12 = vsel %vm1007_vm10, %v993_v62, 0 }
 0x210   :  { %1027 = vmatpush1.bf16.msra.mxu0 %v1009_v12 }
 0x211   :  { %v995_v13 = vpack.c.bf16 %v934_v5, %v934_v5  ;;  %v996_v16 = vpack.c.bf16 %v935_v11, %v935_v11  ;;  %v817_v17 = vpop.permute.xlu1 %816  ;;  %v797_v5 = vrot.slane %v2750_v4, %v3371_v9  ;;  %v801_v11 = vrot.slane %v2750_v4, %v3374_v10 }
 0x212   :  { %v823_v28 = vsel %vm322_vm4, %v817_v17, %v819_v3  ;;  %v824_v29 = vsel %vm322_vm4, %v815_v57, %v817_v17 }
 0x213   :  { %v857_v18 = vpop.permute.xlu0 %856  ;;  %2756 = vmatprep.subr.msk.bf16.mxu1 %vm1007_vm10, %v996_v16  ;;  %v1015_v19 = vsel %vm1007_vm10, %v995_v13, 0  ;;  %v848_v39 = vmul.f32 %v831_v24, %v824_v29  ;;  %v849_v40 = vmul.f32 %v835_v25, %v823_v28  ;;  %v2749_v25 = vld [vmem:[%s3823_s7 + $0xc] sm:$0xf] }
 0x214   :  { %1068 = vmatpush1.bf16.msra.mxu1 %v1015_v19 }
 0x215   :  { %v821_v22 = vpop.permute.xlu1 %820 }
 0x216   :  { %v822_v45 = vsel %vm322_vm4, %v819_v3, %v821_v22  ;;  %v825_v46 = vsel %vm322_vm4, %v821_v22, %v815_v57 }
 0x217   :  { %v861_v23 = vpop.permute.xlu0 %860  ;;  %v850_v56 = vmul.f32 %v839_v30, %v822_v45  ;;  %v851_v58 = vmul.f32 %v843_v31, %v825_v46 }
 0x219   :  { %v859_v32 = vpop.permute.xlu1 %858 }
 0x21a   :  { %v865_v33 = vsel %vm366_vm2, %v859_v32, %v861_v23  ;;  %v866_v34 = vsel %vm366_vm2, %v857_v18, %v859_v32  ;;  %v751_v32 = vrot.slane %v2749_v25, %v3371_v9 }
 0x21b   :  { %v773_v35 = vpop.permute.xlu0 %772  ;;  %v890_v42 = vmul.f32 %v873_v26, %v866_v34  ;;  %v891_v43 = vmul.f32 %v877_v27, %v865_v33 }
 0x21d   :  { %v989_v48 = vpack.c.bf16 %v890_v42, %v848_v39  ;;  %v863_v49 = vpop.permute.xlu1 %862  ;;  %v990_v50 = vpack.c.bf16 %v891_v43, %v849_v40  ;;  %v755_v40 = vrot.slane %v2749_v25, %v3374_v10 }
 0x21e   :  { %v864_v51 = vsel %vm366_vm2, %v861_v23, %v863_v49  ;;  %v867_v52 = vsel %vm366_vm2, %v863_v49, %v857_v18 }
 0x21f   :  { %v777_v53 = vpop.permute.xlu0 %776  ;;  %v892_v59 = vmul.f32 %v881_v36, %v864_v51  ;;  %v893_v60 = vmul.f32 %v885_v37, %v867_v52  ;;  %1028 = vmatprep.subr.bf16.mxu0 %v990_v50 }
 0x220   :  { %1029 = vmatpush1.bf16.msra.mxu0 %v989_v48 }
 0x221   :  { %v991_v57 = vpack.c.bf16 %v892_v59, %v850_v56  ;;  %v775_v61 = vpop.permute.xlu1 %774  ;;  %v992_v62 = vpack.c.bf16 %v893_v60, %v851_v58 }
 0x222   :  { %v781_v63 = vsel %vm266_vm1, %v775_v61, %v777_v53  ;;  %v782_v0 = vsel %vm266_vm1, %v773_v35, %v775_v61 }
 0x223   :  { %v685_v1 = vpop.permute.xlu0 %684  ;;  %v806_v2 = vmul.f32 %v789_v54, %v782_v0  ;;  %v807_v3 = vmul.f32 %v793_v55, %v781_v63  ;;  %1069 = vmatprep.subr.bf16.mxu1 %v992_v62  ;;  %v612_v62 = vld [vmem:[%s3823_s7] sm:$0xf]  ;;  %v2747_v0 = vld [vmem:[%s3823_s7 + $0x4] sm:$0xf] }
 0x224   :  { %1070 = vmatpush1.bf16.msra.mxu1 %v991_v57 }
 0x225   :  { %v985_v12 = vpack.c.bf16 %v806_v2, %v3519_v38  ;;  %v779_v13 = vpop.permute.xlu1 %778  ;;  %v986_v16 = vpack.c.bf16 %v807_v3, %v3527_v44  ;;  %v2748_v44 = vld [vmem:[%s3823_s7 + $0x8] sm:$0xf]  ;;  %v621_v2 = vrot.slane %v612_v62, %v3383_v15  ;;  %v663_v3 = vrot.slane %v2747_v0, %v3383_v15 }
 0x226   :  { %v780_v17 = vsel %vm266_vm1, %v777_v53, %v779_v13  ;;  %v783_v18 = vsel %vm266_vm1, %v779_v13, %v773_v35  ;;  %v705_v28 = vrot.slane %v2748_v44, %v3383_v15  ;;  %v701_v29 = vrot.slane %v2748_v44, %v3380_v14 }
 0x227   :  { %v689_v19 = vpop.permute.xlu0 %688  ;;  %v808_v20 = vmul.f32 %v797_v5, %v780_v17  ;;  %v809_v21 = vmul.f32 %v801_v11, %v783_v18  ;;  %1030 = vmatprep.subr.bf16.mxu0 %v986_v16  ;;  %v713_v31 = vrot.slane %v2748_v44, %v3374_v10  ;;  %v743_v35 = vrot.slane %v2749_v25, %v3380_v14 }
 0x228   :  { %1031 = vmatpush1.bf16.msra.mxu0 %v985_v12  ;;  %v709_v42 = vrot.slane %v2748_v44, %v3371_v9  ;;  %v617_v11 = vrot.slane %v612_v62, %v3380_v14  ;;  %v629_v13 = vrot.slane %v612_v62, %v3374_v10  ;;  %v667_v17 = vrot.slane %v2747_v0, %v3371_v9 }
 0x229   :  { %v987_v22 = vpack.c.bf16 %v808_v20, %v3521_v41  ;;  %v687_v23 = vpop.permute.xlu1 %686  ;;  %v988_v24 = vpack.c.bf16 %v809_v21, %v3533_v47  ;;  %v747_v41 = vrot.slane %v2749_v25, %v3383_v15 }
 0x22a   :  { %v694_v47 = vsel %vm162_vm8, %v685_v1, %v687_v23  ;;  %v693_v45 = vsel %vm162_vm8, %v687_v23, %v689_v19  ;;  %v625_v23 = vrot.slane %v612_v62, %v3371_v9  ;;  %v3106_v62 = vld [vmem:[#allocation5 + $0x8] sm:$0xff]  }
 0x22b   :  { %v727_v38 = vpop.permute.xlu0 %726  ;;  %1071 = vmatprep.subr.bf16.mxu1 %v988_v24  ;;  %v719_v36 = vmul.f32 %v705_v28, %v694_v47  ;;  %v720_v58 = vmul.f32 %v709_v42, %v693_v45  ;;  %v3088_v42 = vld [vmem:[#allocation5 + $0xb0] sm:$0xff]   ;;  %v3091_v45 = vld [vmem:[#allocation5 + $0xe8] sm:$0xff]  }
 0x22c   :  { %1072 = vmatpush1.bf16.msra.mxu1 %v987_v22  ;;  %v671_v22 = vrot.slane %v2747_v0, %v3374_v10 }
 0x22d   :  { %v691_v26 = vpop.permute.xlu1 %690 }
 0x22e   :  { %v692_v43 = vsel %vm162_vm8, %v689_v19, %v691_v26  ;;  %v695_v4 = vsel %vm162_vm8, %v691_v26, %v685_v1  ;;  %v659_v19 = vrot.slane %v2747_v0, %v3380_v14  ;;  %v3108_v0 = vld [vmem:[#allocation5 + $0x88] sm:$0xff]  }
 0x22f   :  { %v731_v27 = vpop.permute.xlu0 %730  ;;  %v718_v53 = vmul.f32 %v701_v29, %v695_v4  ;;  %v721_v54 = vmul.f32 %v713_v31, %v692_v43  ;;  %v3089_v43 = vld [vmem:[#allocation5 + $0x68] sm:$0xff]  }
 0x230   :  { %v3090_v4 = vld [vmem:[#allocation5 + $0x28] sm:$0xff]  }
 0x231   :  { %v729_v30 = vpop.permute.xlu1 %728 }
 0x232   :  { %v736_v33 = vsel %vm206_vm6, %v727_v38, %v729_v30  ;;  %v735_v37 = vsel %vm206_vm6, %v729_v30, %v731_v27  ;;  %v3081_v30 = vld [vmem:[#allocation5 + $0x78] sm:$0xff]  }
 0x233   :  { %v601_v34 = vpop.permute.xlu0 %600  ;;  %v761_v39 = vmul.f32 %v747_v41, %v736_v33  ;;  %v762_v49 = vmul.f32 %v751_v32, %v735_v37  ;;  %v3085_v37 = vld [vmem:[#allocation5 + $0x70] sm:$0xff]  }
 0x235   :  { %v733_v46 = vpop.permute.xlu1 %732  ;;  %v982_v48 = vpack.c.bf16 %v761_v39, %v719_v36  ;;  %v983_v61 = vpack.c.bf16 %v762_v49, %v720_v58  ;;  %v3084_v36 = vld [vmem:[#allocation5 + $0xb8] sm:$0xff]   ;;  %v3086_v39 = vld [vmem:[#allocation5 + $0x30] sm:$0xff]   ;;  %v3094_v49 = vld [vmem:[#allocation5 + $0x20] sm:$0xff]  }
 0x236   :  { %v734_v50 = vsel %vm206_vm6, %v731_v27, %v733_v46  ;;  %v737_v51 = vsel %vm206_vm6, %v733_v46, %v727_v38  ;;  %v3092_v46 = vld [vmem:[#allocation5 + $0xa8] sm:$0xff]   ;;  %v3102_v58 = vld [vmem:[#allocation5 + $0x10] sm:$0xff]  }
 0x237   :  { %v605_v52 = vpop.permute.xlu0 %604  ;;  %v760_v55 = vmul.f32 %v743_v35, %v737_v51  ;;  %v763_v56 = vmul.f32 %v755_v40, %v734_v50  ;;  %1032 = vmatprep.subr.bf16.mxu0 %v982_v48  ;;  %v3082_v35 = vld [vmem:[#allocation5 + $0x38] sm:$0xff]   ;;  %v3087_v40 = vld [vmem:[#allocation5 + $0xf0] sm:$0xff]   ;;  %v3093_v48 = vld [vmem:[#allocation5 + $0x60] sm:$0xff]  }
 0x238   :  { %v3095_v50 = vld [vmem:[#allocation5 + $0xe0] sm:$0xff]  }
 0x239   :  { %v981_v59 = vpack.c.bf16 %v760_v55, %v718_v53  ;;  %v603_v60 = vpop.permute.xlu1 %602  ;;  %v984_v57 = vpack.c.bf16 %v763_v56, %v721_v54  ;;  %v3096_v51 = vld [vmem:[#allocation5 + $0xa0] sm:$0xff]   ;;  %v3098_v53 = vld [vmem:[#allocation5 + $0x18] sm:$0xff]   ;;  %v3101_v56 = vld [vmem:[#allocation5 + $0x50] sm:$0xff]  }
 0x23a   :  { %v610_v5 = vsel %vm63_vm7, %v601_v34, %v603_v60  ;;  %v609_v44 = vsel %vm63_vm7, %v603_v60, %v605_v52  ;;  %v3099_v54 = vld [vmem:[#allocation5 + $0xd8] sm:$0xff]   ;;  %v3104_v60 = vld [vmem:[#allocation5 + $0x90] sm:$0xff]  }
 0x23b   :  { %1033 = vmatpush1.bf16.msra.mxu0 %v981_v59  ;;  %1073 = vmatprep.subr.bf16.mxu1 %v984_v57  ;;  %v643_v63 = vpop.permute.xlu0 %642  ;;  %v635_v20 = vmul.f32 %v621_v2, %v610_v5  ;;  %v636_v29 = vmul.f32 %v625_v23, %v609_v44  ;;  %v3100_v55 = vld [vmem:[#allocation5 + $0x98] sm:$0xff]   ;;  %v3103_v59 = vld [vmem:[#allocation5 + $0xd0] sm:$0xff]   ;;  %v3105_v57 = vld [vmem:[#allocation5 + $0x48] sm:$0xff]  }
 0x23c   :  { %1074 = vmatpush1.bf16.msra.mxu1 %v983_v61  ;;  %v3107_v61 = vld [vmem:[#allocation5 + $0xc8] sm:$0xff]   ;;  %v3110_v2 = vld [vmem:[#allocation5] sm:$0xff]   ;;  %v3113_v5 = vld [vmem:[#allocation5 + $0x178] sm:$0xff]  }
 0x23d   :  { %v607_v1 = vpop.permute.xlu1 %606 }
 0x23e   :  { %v608_v24 = vsel %vm63_vm7, %v605_v52, %v607_v1  ;;  %v611_v38 = vsel %vm63_vm7, %v607_v1, %v601_v34  ;;  %v940_v34 = vld [vmem:[%s3819_s3] sm:$0xf]  ;;  %v3097_v52 = vld [vmem:[#allocation5 + $0x58] sm:$0xff]  }
 0x23f   :  { %v647_v16 = vpop.permute.xlu0 %646  ;;  %v634_v28 = vmul.f32 %v617_v11, %v611_v38  ;;  %v637_v9 = vmul.f32 %v629_v13, %v608_v24  ;;  %v3111_v1 = vld [vmem:[#allocation5 + $0xc0] sm:$0xff]   ;;  %v3116_v11 = vld [vmem:[#allocation5 + $0x1f8] sm:$0xff]  }
 0x241   :  { %v645_v12 = vpop.permute.xlu1 %644 }
 0x242   :  { %v652_v18 = vsel %vm106_vm5, %v643_v63, %v645_v12  ;;  %v651_v15 = vsel %vm106_vm5, %v645_v12, %v647_v16  ;;  %v3269_v12 = vmov 1966171168  }
 0x243   :  { %v677_v21 = vmul.f32 %v663_v3, %v652_v18  ;;  %v678_v26 = vmul.f32 %v667_v17, %v651_v15  ;;  %v3112_v3 = vld [vmem:[#allocation5 + $0x80] sm:$0xff]   ;;  %v1110_v13 = vunpack.c.l.s4 %v3269_v12  ;;  %v3114_v12 = vld [vmem:[#allocation5 + $0x138] sm:$0xff]  }
 0x245   :  { %v649_v25 = vpop.permute.xlu1 %648  ;;  %v978_v14 = vpack.c.bf16 %v677_v21, %v635_v20  ;;  %v979_v33 = vpack.c.bf16 %v678_v26, %v636_v29  ;;  %v1111_v18 = vunpack.c.0.s8 %v1110_v13 }
 0x246   :  { %v650_v27 = vsel %vm106_vm5, %v647_v16, %v649_v25  ;;  %v653_v10 = vsel %vm106_vm5, %v649_v25, %v643_v63  ;;  %v3109_v63 = vld [vmem:[#allocation5 + $0x40] sm:$0xff]  }
 0x247   :  { %v676_v41 = vmul.f32 %v659_v19, %v653_v10  ;;  %v679_v47 = vmul.f32 %v671_v22, %v650_v27  ;;  %1034 = vmatprep.subr.bf16.mxu0 %v978_v14  ;;  %v1114_v44 = vsub.s32 %v1111_v18, %v3365_v7 }
 0x249   :  { %v977_v31 = vpack.c.bf16 %v676_v41, %v634_v28  ;;  %v980_v32 = vpack.c.bf16 %v679_v47, %v637_v9 }
 0x24b   :  { %1035 = vmatpush1.bf16.msra.mxu0 %v977_v31  ;;  %1075 = vmatprep.subr.bf16.mxu1 %v980_v32 }
 0x24c   :  { %1076 = vmatpush1.bf16.msra.mxu1 %v979_v33  ;;  %2887 = vmatprep.subr.bf16.mxu0 %v3081_v30  ;;  %v1001_v16 = vpop.permute.xlu0 %1000  ;;  %v3137_v33 = vld [vmem:[#allocation5 + $0x1d0] sm:$0xff]  }
 0x24d   :  { %2909 = vmatprep.subr.bf16.mxu1 %v3083_v8  ;;  %v3270_v8 = vmov 1983009808  }
 0x24e   :  { %2755 = vmatmul.mubr.msk.bf16.vlgmr.msra.gmra.mxu0 %vm1003_vm11, %v940_v34 }
 0x24f   :  { %2757 = vmatmul.mubr.msk.bf16.vlgmr.msra.gmra.mxu1 %vm1003_vm11, %v940_v34  ;;  %2888 = vmatpush3.bf16.msra.mxu0 %v3082_v35 }
 0x250   :  { %2910 = vmatpush3.bf16.msra.mxu1 %v3084_v36  ;;  %2889 = vmatprep.subr.bf16.mxu0 %v3085_v37  ;;  %v1271_v36 = vunpack.c.l.s4 %v3270_v8 }
 0x251   :  { %2911 = vmatprep.subr.bf16.mxu1 %v3087_v40 }
 0x253   :  { %2890 = vmatpush3.bf16.msra.mxu0 %v3086_v39 }
 0x254   :  { %2912 = vmatpush3.bf16.msra.mxu1 %v3088_v42  ;;  %2891 = vmatprep.subr.bf16.mxu0 %v3089_v43 }
 0x255   :  { %2913 = vmatprep.subr.bf16.mxu1 %v3091_v45 }
 0x257   :  { %2892 = vmatpush3.bf16.msra.mxu0 %v3090_v4 }
 0x258   :  { %2914 = vmatpush3.bf16.msra.mxu1 %v3092_v46  ;;  %2893 = vmatprep.subr.bf16.mxu0 %v3093_v48 }
 0x259   :  { %2915 = vmatprep.subr.bf16.mxu1 %v3095_v50 }
 0x25b   :  { %2894 = vmatpush3.bf16.msra.mxu0 %v3094_v49 }
 0x25c   :  { %2916 = vmatpush3.bf16.msra.mxu1 %v3096_v51  ;;  %2895 = vmatprep.subr.bf16.mxu0 %v3097_v52 }
 0x25d   :  { %2917 = vmatprep.subr.bf16.mxu1 %v3099_v54 }
 0x25f   :  { %2896 = vmatpush3.bf16.msra.mxu0 %v3098_v53 }
 0x260   :  { %2918 = vmatpush3.bf16.msra.mxu1 %v3100_v55  ;;  %2897 = vmatprep.subr.bf16.mxu0 %v3101_v56 }
 0x261   :  { %2919 = vmatprep.subr.bf16.mxu1 %v3103_v59 }
 0x263   :  { %2898 = vmatpush3.bf16.msra.mxu0 %v3102_v58 }
 0x264   :  { %2899 = vmatprep.subr.bf16.mxu0 %v3105_v57  ;;  %2920 = vmatpush3.bf16.msra.mxu1 %v3104_v60  ;;  %v1272_v60 = vunpack.c.0.s8 %v1271_v36  ;;  %v3138_v36 = vld [vmem:[#allocation5 + $0x190] sm:$0xff]  }
 0x265   :  { %2921 = vmatprep.subr.bf16.mxu1 %v3107_v61 }
 0x266   :  { %v3764_v57 = vsub.s32 %v1272_v60, %v3365_v7  ;;  %v3154_v60 = vld [vmem:[#allocation5 + $0x2f0] sm:$0xff]  }
 0x267   :  { %2900 = vmatpush3.bf16.msra.mxu0 %v3106_v62 }
 0x268   :  { %2901 = vmatprep.subr.bf16.mxu0 %v3109_v63  ;;  %2922 = vmatpush3.bf16.msra.mxu1 %v3108_v0 }
 0x269   :  { %2923 = vmatprep.subr.bf16.mxu1 %v3111_v1 }
 0x26b   :  { %2902 = vmatpush3.bf16.msra.mxu0 %v3110_v2 }
 0x26c   :  { %2924 = vmatpush3.bf16.msra.mxu1 %v3112_v3  ;;  %2931 = vmatprep.subr.bf16.mxu0 %v3113_v5 }
 0x26d   :  { %2953 = vmatprep.subr.bf16.mxu1 %v3116_v11 }
 0x30e   :  { %v1054_v17 = vpop.f32.mrf.mxu0 }
 0x30f   :  { %v1055_v19 = vadd.f32 %v1054_v17, %v1001_v16  ;;  %v1095_v20 = vpop.f32.mrf.mxu1 }
 0x310   :  { %v1096_v15 = vadd.f32 %v1095_v20, %v1001_v16  ;;  %v1056_v21 = vpop.f32.mrf.mxu0  ;;  %v3117_v20 = vld [vmem:[#allocation5 + $0x1b8] sm:$0xff]  }
 0x311   :  { %v1057_v22 = vadd.f32 %v1056_v21, %v1001_v16  ;;  %v1097_v23 = vpop.f32.mrf.mxu1  ;;  %v1102_v25 = vmax.f32 %v1055_v19, 0.0 }
 0x312   :  { %v1098_v24 = vadd.f32 %v1097_v23, %v1001_v16  ;;  %v1058_v38 = vpop.f32.mrf.mxu0  ;;  %v1104_v27 = vmax.f32 %v1096_v15, 0.0  ;;  %v3118_v15 = vld [vmem:[#allocation5 + $0x170] sm:$0xff]  }
 0x313   :  { %v1103_v14 = vmax.f32 %v1057_v22, 0.0  ;;  %v1099_v26 = vpop.f32.mrf.mxu1  ;;  %v3121_v23 = vld [vmem:[#allocation5 + $0x1f0] sm:$0xff]  }
 0x314   :  { %v1105_v10 = vmax.f32 %v1098_v24, 0.0  ;;  %v1059_v28 = vpop.f32.mrf.mxu0  ;;  %v3120_v24 = vld [vmem:[#allocation5 + $0x130] sm:$0xff]   ;;  %v3124_v26 = vld [vmem:[#allocation5 + $0x128] sm:$0xff]  }
 0x315   :  { %v1108_v9 = vcombine.low %v1102_v25, %v1103_v14  ;;  %v1187_v41 = vcombine.high %v1102_v25, %v1103_v14  ;;  %v1100_v47 = vpop.f32.mrf.mxu1  ;;  %v3122_v25 = vld [vmem:[#allocation5 + $0x1b0] sm:$0xff]   ;;  %v3125_v14 = vld [vmem:[#allocation5 + $0x1e8] sm:$0xff]   ;;  %v3129_v28 = vld [vmem:[#allocation5 + $0x1e0] sm:$0xff]  }
 0x316   :  { %v1131_v29 = vcombine.low %v1104_v27, %v1105_v10  ;;  %v1205_v30 = vcombine.high %v1104_v27, %v1105_v10  ;;  %v3127_v27 = vld [vmem:[#allocation5 + $0x160] sm:$0xff]   ;;  %v3126_v10 = vld [vmem:[#allocation5 + $0x1a8] sm:$0xff]  }
 0x317   :  { %v1115_v31 = vrot.slane %v1108_v9, %v1114_v44  ;;  %v1194_v32 = vrot.slane %v1187_v41, %v1114_v44  ;;  %v3128_v9 = vld [vmem:[#allocation5 + $0x120] sm:$0xff]   ;;  %v3131_v41 = vld [vmem:[#allocation5 + $0x158] sm:$0xff]  }
 0x318   :  { %v1138_v34 = vrot.slane %v1131_v29, %v1114_v44  ;;  %v1212_v35 = vrot.slane %v1205_v30, %v1114_v44  ;;  %v3130_v47 = vld [vmem:[#allocation5 + $0x1a0] sm:$0xff]   ;;  %v3133_v29 = vld [vmem:[#allocation5 + $0x1d8] sm:$0xff]  }
 0x319   :  { %v1122_v37 = vrot.slane %v1115_v31, %v1114_v44  ;;  %v1149_v39 = vcombine.high %v1115_v31, %v1115_v31  ;;  %v1201_v40 = vrot.slane %v1194_v32, %v1114_v44  ;;  %v1223_v42 = vcombine.high %v1194_v32, %v1194_v32  ;;  %v3132_v30 = vld [vmem:[#allocation5 + $0x118] sm:$0xff]   ;;  %v3135_v31 = vld [vmem:[#allocation5 + $0x150] sm:$0xff]  }
 0x31a   :  { %v1145_v43 = vrot.slane %v1138_v34, %v1114_v44  ;;  %v1160_v4 = vcombine.high %v1138_v34, %v1138_v34  ;;  %v1219_v45 = vrot.slane %v1212_v35, %v1114_v44  ;;  %v1234_v46 = vcombine.high %v1212_v35, %v1212_v35  ;;  %v3134_v32 = vld [vmem:[#allocation5 + $0x198] sm:$0xff]   ;;  %v3136_v34 = vld [vmem:[#allocation5 + $0x110] sm:$0xff]   ;;  %v3139_v35 = vld [vmem:[#allocation5 + $0x148] sm:$0xff]  }
 0x31b   :  { %1128 = vst.msk [vmem:[#allocation4] ss:$2 sm:$0x3] %vm3727_vm12, %v1122_v37  ;;  %v1156_v48 = vrot.slane %v1149_v39, %v1114_v44  ;;  %v1171_v6 = vcombine.high %v1122_v37, %v1122_v37  ;;  %1204 = vst.msk [vmem:[#allocation4 + $0x10] ss:$2 sm:$0x3] %vm3727_vm12, %v1201_v40  ;;  %v1230_v49 = vrot.slane %v1223_v42, %v1114_v44 }
 0x31c   :  { %v1245_v50 = vcombine.high %v1201_v40, %v1201_v40  ;;  %1148 = vst.msk [vmem:[#allocation4 + $0x1] ss:$2 sm:$0x3] %vm3727_vm12, %v1145_v43  ;;  %v1167_v51 = vrot.slane %v1160_v4, %v1114_v44  ;;  %v1175_v52 = vcombine.high %v1145_v43, %v1145_v43  ;;  %1222 = vst.msk [vmem:[#allocation4 + $0x11] ss:$2 sm:$0x3] %vm3727_vm12, %v1219_v45 }
 0x31d   :  { %v1241_v53 = vrot.slane %v1234_v46, %v1114_v44  ;;  %v1249_v54 = vcombine.high %v1219_v45, %v1219_v45  ;;  %1159 = vst.msk [vmem:[#allocation4 + $0x4] ss:$2 sm:$0x3] %vm3727_vm12, %v1156_v48  ;;  %1174 = vst.msk [vmem:[#allocation4 + $0x8] ss:$2 sm:$0x3] %vm3727_vm12, %v1171_v6  ;;  %v1179_v55 = vcombine.high %v1156_v48, %v1156_v48 }
 0x31e   :  { %1233 = vst.msk [vmem:[#allocation4 + $0x14] ss:$2 sm:$0x3] %vm3727_vm12, %v1230_v49  ;;  %1248 = vst.msk [vmem:[#allocation4 + $0x18] ss:$2 sm:$0x3] %vm3727_vm12, %v1245_v50  ;;  %v1253_v56 = vcombine.high %v1230_v49, %v1230_v49  ;;  %v1183_v58 = vcombine.high %v1167_v51, %v1167_v51 }
 0x31f   :  { %1170 = vst.msk [vmem:[#allocation4 + $0x5] ss:$2 sm:$0x3] %vm3727_vm12, %v1167_v51  ;;  %1178 = vst.msk [vmem:[#allocation4 + $0x9] ss:$2 sm:$0x3] %vm3727_vm12, %v1175_v52  ;;  %v1257_v59 = vcombine.high %v1241_v53, %v1241_v53 }
 0x320   :  { %1244 = vst.msk [vmem:[#allocation4 + $0x15] ss:$2 sm:$0x3] %vm3727_vm12, %v1241_v53  ;;  %1252 = vst.msk [vmem:[#allocation4 + $0x19] ss:$2 sm:$0x3] %vm3727_vm12, %v1249_v54 }
 0x321   :  { %1182 = vst.msk [vmem:[#allocation4 + $0xc] ss:$2 sm:$0x3] %vm3727_vm12, %v1179_v55  ;;  %1256 = vst.msk [vmem:[#allocation4 + $0x1c] ss:$2 sm:$0x3] %vm3727_vm12, %v1253_v56 }
 0x322   :  { %1186 = vst.msk [vmem:[#allocation4 + $0xd] ss:$2 sm:$0x3] %vm3727_vm12, %v1183_v58  ;;  %1260 = vst.msk [vmem:[#allocation4 + $0x1d] ss:$2 sm:$0x3] %vm3727_vm12, %v1257_v59 }
 0x323   :  { %v3123_v44 = vld [vmem:[#allocation5 + $0x168] sm:$0xff]   ;;  %v3143_v42 = vld [vmem:[#allocation5 + $0x140] sm:$0xff]   ;;  %v3147_v6 = vld [vmem:[#allocation5 + $0x278] sm:$0xff]  }
 0x324   :  { %v3141_v37 = vld [vmem:[#allocation5 + $0x1c8] sm:$0xff]   ;;  %v3145_v45 = vld [vmem:[#allocation5 + $0x1c0] sm:$0xff]   ;;  %v3149_v51 = vld [vmem:[#allocation5 + $0x2f8] sm:$0xff]  }
 0x325   :  { %v3140_v39 = vld [vmem:[#allocation5 + $0x108] sm:$0xff]   ;;  %v3144_v46 = vld [vmem:[#allocation5 + $0x100] sm:$0xff]   ;;  %v3148_v52 = vld [vmem:[#allocation5 + $0x238] sm:$0xff]  }
 0x326   :  { %v1261_v61 = vld [vmem:[#allocation4] sm:$0xff]  ;;  %v3142_v43 = vld [vmem:[#allocation5 + $0x188] sm:$0xff]   ;;  %v3152_v55 = vld [vmem:[#allocation5 + $0x270] sm:$0xff]  }
 0x327   :  { %v1276_v62 = vrot.slane %v1261_v61, %v3764_v57  ;;  %v1269_v63 = vcombine.high %v1261_v61, %v1261_v61  ;;  %v1263_v8 = vld [vmem:[#allocation4 + $0x10] sm:$0xff]  ;;  %v3146_v49 = vld [vmem:[#allocation5 + $0x180] sm:$0xff]   ;;  %v3150_v58 = vld [vmem:[#allocation5 + $0x2b8] sm:$0xff]  }
 0x328   :  { %v1303_v40 = vcombine.high %v1263_v8, %v1263_v8  ;;  %v3779_v4 = vrot.slane %v1263_v8, %v3764_v57  ;;  %v3187_v8 = vld [vmem:[#allocation5 + $0x3f0] sm:$0xff]  }
 0x329   :  { %v1262_v0 = vld [vmem:[#allocation4 + $0x8] sm:$0xff]  ;;  %v1284_v1 = vcombine.high %v1276_v62, %v1276_v62  ;;  %v1283_v2 = vrot.slane %v1269_v63, %v3764_v57  ;;  %v1353_v7 = vpack.c.bf16 %v1276_v62, %v1276_v62  ;;  %v3153_v62 = vld [vmem:[#allocation5 + $0x230] sm:$0xff]  }
 0x32a   :  { %v3769_v3 = vrot.slane %v1262_v0, %v3764_v57  ;;  %v1286_v5 = vcombine.high %v1262_v0, %v1262_v0  ;;  %v3782_v48 = vrot.slane %v1303_v40, %v3764_v57  ;;  %v1318_v50 = vcombine.high %v3779_v4, %v3779_v4  ;;  %v3156_v63 = vld [vmem:[#allocation5 + $0x268] sm:$0xff]   ;;  %v3155_v0 = vld [vmem:[#allocation5 + $0x2b0] sm:$0xff]  }
 0x32b   :  { %v1354_v11 = vpack.c.bf16 %v1284_v1, %v1284_v1  ;;  %v1285_v13 = vcombine.high %v1283_v2, %v1283_v2  ;;  %v1355_v21 = vpack.c.bf16 %v1283_v2, %v1283_v2  ;;  %v3158_v1 = vld [vmem:[#allocation5 + $0x2e8] sm:$0xff]   ;;  %v3188_v40 = vld [vmem:[#allocation5 + $0x3b0] sm:$0xff]  }
 0x32c   :  { %v1301_v16 = vcombine.high %v3769_v3, %v3769_v3  ;;  %v3774_v17 = vrot.slane %v1286_v5, %v3764_v57  ;;  %v1319_v53 = vcombine.high %v3782_v48, %v3782_v48  ;;  %v1357_v54 = vpack.c.bf16 %v3769_v3, %v3769_v3  ;;  %v3157_v2 = vld [vmem:[#allocation5 + $0x228] sm:$0xff]   ;;  %v3160_v3 = vld [vmem:[#allocation5 + $0x260] sm:$0xff]  }
 0x32d   :  { %2432 = vmatprep.mubr.bf16.mxu0 %v1354_v11  ;;  %v1356_v18 = vpack.c.bf16 %v1285_v13, %v1285_v13  ;;  %v1362_v56 = vpack.c.bf16 %v1318_v50, %v1318_v50  ;;  %v3159_v5 = vld [vmem:[#allocation5 + $0x2a8] sm:$0xff]   ;;  %v3162_v11 = vld [vmem:[#allocation5 + $0x2e0] sm:$0xff]   ;;  %v3164_v13 = vld [vmem:[#allocation5 + $0x258] sm:$0xff]  }
 0x32e   :  { %v1358_v19 = vpack.c.bf16 %v1301_v16, %v1301_v16  ;;  %2433 = vmatmul.mubr.bf16.vlgmr.msra.gmra.mxu0 %v1353_v7  ;;  %v1302_v22 = vcombine.high %v3774_v17, %v3774_v17  ;;  %v1359_v59 = vpack.c.bf16 %v3774_v17, %v3774_v17  ;;  %v1364_v61 = vpack.c.bf16 %v1319_v53, %v1319_v53  ;;  %v3163_v16 = vld [vmem:[#allocation5 + $0x2a0] sm:$0xff]   ;;  %v3166_v7 = vld [vmem:[#allocation5 + $0x2d8] sm:$0xff]  }
 0x32f   :  { %2932 = vmatpush3.bf16.msra.mxu0 %v3114_v12  ;;  %2472 = vmatprep.mubr.bf16.mxu1 %v1356_v18  ;;  %v3161_v12 = vld [vmem:[#allocation5 + $0x220] sm:$0xff]   ;;  %v3165_v17 = vld [vmem:[#allocation5 + $0x218] sm:$0xff]   ;;  %v3168_v18 = vld [vmem:[#allocation5 + $0x250] sm:$0xff]  }
 0x330   :  { %2512 = vmatprep.mubr.bf16.mxu0 %v1358_v19  ;;  %2473 = vmatmul.mubr.bf16.vlgmr.msra.gmra.mxu1 %v1355_v21  ;;  %v1360_v38 = vpack.c.bf16 %v1302_v22, %v1302_v22  ;;  %v3167_v19 = vld [vmem:[#allocation5 + $0x298] sm:$0xff]   ;;  %v3172_v21 = vld [vmem:[#allocation5 + $0x248] sm:$0xff]  }
 0x331   :  { %2954 = vmatpush3.bf16.msra.mxu1 %v3117_v20  ;;  %2933 = vmatprep.subr.bf16.mxu0 %v3118_v15  ;;  %v3170_v20 = vld [vmem:[#allocation5 + $0x2d0] sm:$0xff]   ;;  %v1264_v22 = vld [vmem:[#allocation4 + $0x18] sm:$0xff] }
 0x332   :  { %2552 = vmatprep.mubr.bf16.mxu1 %v1360_v38  ;;  %2955 = vmatprep.subr.bf16.mxu1 %v3121_v23  ;;  %v3169_v15 = vld [vmem:[#allocation5 + $0x210] sm:$0xff]   ;;  %v3173_v38 = vld [vmem:[#allocation5 + $0x208] sm:$0xff]   ;;  %v3199_v50 = vld [vmem:[#allocation5 + $0x3d8] sm:$0xff]  }
 0x333   :  { %2934 = vmatpush3.bf16.msra.mxu0 %v3120_v24  ;;  %v3171_v23 = vld [vmem:[#allocation5 + $0x290] sm:$0xff]   ;;  %v3174_v24 = vld [vmem:[#allocation5 + $0x2c8] sm:$0xff]   ;;  %v3200_v53 = vld [vmem:[#allocation5 + $0x398] sm:$0xff]  }
 0x334   :  { %2935 = vmatprep.subr.bf16.mxu0 %v3123_v44  ;;  %v1320_v44 = vcombine.high %v1264_v22, %v1264_v22 }
 0x335   :  { %2956 = vmatpush3.bf16.msra.mxu1 %v3122_v25  ;;  %v3176_v25 = vld [vmem:[#allocation5 + $0x240] sm:$0xff]  }
 0x336   :  { %2957 = vmatprep.subr.bf16.mxu1 %v3125_v14  ;;  %v3175_v14 = vld [vmem:[#allocation5 + $0x288] sm:$0xff]  }
 0x337   :  { %2936 = vmatpush3.bf16.msra.mxu0 %v3124_v26  ;;  %v3793_v26 = vrot.slane %v1264_v22, %v3764_v57 }
 0x338   :  { %2937 = vmatprep.subr.bf16.mxu0 %v3127_v27  ;;  %v3178_v27 = vld [vmem:[#allocation5 + $0x2c0] sm:$0xff]  }
 0x339   :  { %2958 = vmatpush3.bf16.msra.mxu1 %v3126_v10  ;;  %v3177_v10 = vld [vmem:[#allocation5 + $0x200] sm:$0xff]  }
 0x33a   :  { %2959 = vmatprep.subr.bf16.mxu1 %v3129_v28  ;;  %v3796_v28 = vrot.slane %v1320_v44, %v3764_v57  ;;  %v3185_v57 = vld [vmem:[#allocation5 + $0x370] sm:$0xff]  }
 0x33b   :  { %2938 = vmatpush3.bf16.msra.mxu0 %v3128_v9  ;;  %v3180_v9 = vld [vmem:[#allocation5 + $0x378] sm:$0xff]  }
 0x33c   :  { %2939 = vmatprep.subr.bf16.mxu0 %v3131_v41  ;;  %v3179_v41 = vld [vmem:[#allocation5 + $0x280] sm:$0xff]  }
 0x33d   :  { %2960 = vmatpush3.bf16.msra.mxu1 %v3130_v47  ;;  %v1335_v47 = vcombine.high %v3793_v26, %v3793_v26 }
 0x33e   :  { %2961 = vmatprep.subr.bf16.mxu1 %v3133_v29  ;;  %v3182_v29 = vld [vmem:[#allocation5 + $0x3f8] sm:$0xff]  }
 0x33f   :  { %2940 = vmatpush3.bf16.msra.mxu0 %v3132_v30  ;;  %v3181_v30 = vld [vmem:[#allocation5 + $0x338] sm:$0xff]  }
 0x340   :  { %2941 = vmatprep.subr.bf16.mxu0 %v3135_v31  ;;  %v1336_v31 = vcombine.high %v3796_v28, %v3796_v28 }
 0x341   :  { %2962 = vmatpush3.bf16.msra.mxu1 %v3134_v32  ;;  %v1361_v32 = vpack.c.bf16 %v3779_v4, %v3779_v4  ;;  %v3193_v4 = vld [vmem:[#allocation5 + $0x360] sm:$0xff]  }
 0x342   :  { %2963 = vmatprep.subr.bf16.mxu1 %v3137_v33  ;;  %v1366_v33 = vpack.c.bf16 %v1335_v47, %v1335_v47 }
 0x343   :  { %2942 = vmatpush3.bf16.msra.mxu0 %v3136_v34  ;;  %v3183_v34 = vld [vmem:[#allocation5 + $0x3b8] sm:$0xff]  }
 0x344   :  { %2943 = vmatprep.subr.bf16.mxu0 %v3139_v35  ;;  %v1363_v35 = vpack.c.bf16 %v3782_v48, %v3782_v48  ;;  %v3194_v48 = vld [vmem:[#allocation5 + $0x320] sm:$0xff]  }
 0x345   :  { %2964 = vmatpush3.bf16.msra.mxu1 %v3138_v36  ;;  %v1368_v36 = vpack.c.bf16 %v1336_v31, %v1336_v31 }
 0x346   :  { %2965 = vmatprep.subr.bf16.mxu1 %v3141_v37  ;;  %v3186_v37 = vld [vmem:[#allocation5 + $0x330] sm:$0xff]  }
 0x347   :  { %2944 = vmatpush3.bf16.msra.mxu0 %v3140_v39  ;;  %v3189_v39 = vld [vmem:[#allocation5 + $0x368] sm:$0xff]  }
 0x348   :  { %2945 = vmatprep.subr.bf16.mxu0 %v3143_v42  ;;  %v3191_v42 = vld [vmem:[#allocation5 + $0x3e8] sm:$0xff]  }
 0x349   :  { %2966 = vmatpush3.bf16.msra.mxu1 %v3142_v43  ;;  %v3190_v43 = vld [vmem:[#allocation5 + $0x328] sm:$0xff]  }
 0x34a   :  { %2967 = vmatprep.subr.bf16.mxu1 %v3145_v45  ;;  %v3192_v45 = vld [vmem:[#allocation5 + $0x3a8] sm:$0xff]  }
 0x34b   :  { %2946 = vmatpush3.bf16.msra.mxu0 %v3144_v46  ;;  %v3195_v46 = vld [vmem:[#allocation5 + $0x3e0] sm:$0xff]  }
 0x34c   :  { %2975 = vmatprep.subr.bf16.mxu0 %v3147_v6  ;;  %v3197_v6 = vld [vmem:[#allocation5 + $0x358] sm:$0xff]  }
 0x34d   :  { %2968 = vmatpush3.bf16.msra.mxu1 %v3146_v49  ;;  %v3196_v49 = vld [vmem:[#allocation5 + $0x3a0] sm:$0xff]  }
 0x34e   :  { %2513 = vmatmul.mubr.bf16.vlgmr.msra.gmra.mxu0 %v1357_v54  ;;  %2997 = vmatprep.subr.bf16.mxu1 %v3149_v51  ;;  %v3198_v51 = vld [vmem:[#allocation5 + $0x318] sm:$0xff]   ;;  %v3203_v54 = vld [vmem:[#allocation5 + $0x3d0] sm:$0xff]  }
 0x34f   :  { %2976 = vmatpush3.bf16.msra.mxu0 %v3148_v52  ;;  %2592 = vmatprep.mubr.bf16.mxu0 %v1362_v56  ;;  %v3201_v52 = vld [vmem:[#allocation5 + $0x350] sm:$0xff]   ;;  %v3205_v56 = vld [vmem:[#allocation5 + $0x348] sm:$0xff]  }
 0x350   :  { %2553 = vmatmul.mubr.bf16.vlgmr.msra.gmra.mxu1 %v1359_v59  ;;  %2977 = vmatprep.subr.bf16.mxu0 %v3152_v55  ;;  %v3202_v55 = vld [vmem:[#allocation5 + $0x310] sm:$0xff]   ;;  %v3207_v59 = vld [vmem:[#allocation5 + $0x3c8] sm:$0xff]  }
 0x351   :  { %2998 = vmatpush3.bf16.msra.mxu1 %v3150_v58  ;;  %2632 = vmatprep.mubr.bf16.mxu1 %v1364_v61  ;;  %v3204_v58 = vld [vmem:[#allocation5 + $0x390] sm:$0xff]   ;;  %v3209_v61 = vld [vmem:[#allocation5 + $0x340] sm:$0xff]  }
 0x352   :  { %2999 = vmatprep.subr.bf16.mxu1 %v3154_v60  ;;  %v3206_v60 = vld [vmem:[#allocation5 + $0x308] sm:$0xff]  }
 0x353   :  { %2978 = vmatpush3.bf16.msra.mxu0 %v3153_v62  ;;  %v3208_v62 = vld [vmem:[#allocation5 + $0x388] sm:$0xff]  }
 0x354   :  { %2979 = vmatprep.subr.bf16.mxu0 %v3156_v63  ;;  %v3211_v63 = vld [vmem:[#allocation5 + $0x3c0] sm:$0xff]  }
 0x355   :  { %3000 = vmatpush3.bf16.msra.mxu1 %v3155_v0  ;;  %v3210_v0 = vld [vmem:[#allocation5 + $0x300] sm:$0xff]  }
 0x356   :  { %3001 = vmatprep.subr.bf16.mxu1 %v3158_v1  ;;  %v3212_v1 = vld [vmem:[#allocation5 + $0x380] sm:$0xff]  }
 0x357   :  { %2980 = vmatpush3.bf16.msra.mxu0 %v3157_v2  ;;  %v1365_v2 = vpack.c.bf16 %v3793_v26, %v3793_v26 }
 0x358   :  { %2981 = vmatprep.subr.bf16.mxu0 %v3160_v3  ;;  %v1367_v3 = vpack.c.bf16 %v3796_v28, %v3796_v28 }
 0x359   :  { %3002 = vmatpush3.bf16.msra.mxu1 %v3159_v5 }
 0x35a   :  { %3003 = vmatprep.subr.bf16.mxu1 %v3162_v11  ;;  %v2758_v11 = vld [vmem:[%s3822_s6] ss:$0 sm:$0xff]  ;;  %s3271_s6 = smov [#allocation8]  }
 0x35b   :  { %2982 = vmatpush3.bf16.msra.mxu0 %v3161_v12  ;;  %s2727_s12 = sshll.u32 %s3271_s6, 4  ;;  %s2728_s12 = int_to_ptr.vmem [resolvable:$true] %s2727_s12 }
 0x35c   :  { %2983 = vmatprep.subr.bf16.mxu0 %v3164_v13  ;;  %s3233_s13 = scalar_lea.vmem %s2728_s12, 32  ;;  %p3238_p6 = scmp.lt.s32.totalorder %s2728_s12, %s2728_s12 }
 0x35d   :  { %3004 = vmatpush3.bf16.msra.mxu1 %v3163_v16  ;;  %p3234_p5 = scmp.ne.s32.totalorder %s2728_s12, %s3233_s13  ;;  %p3239_p7 = scmp.lt.s32.totalorder %s3233_s13, %s3233_s13 }
 0x35e   :  { %3005 = vmatprep.subr.bf16.mxu1 %v3166_v7 }
 0x35f   :  { %2984 = vmatpush3.bf16.msra.mxu0 %v3165_v17  ;;  %p3240_p8 = por %p3239_p7, %p3238_p6 }
 0x360   :  { %2985 = vmatprep.subr.bf16.mxu0 %v3168_v18 }
 0x361   :  { %3006 = vmatpush3.bf16.msra.mxu1 %v3167_v19  ;;  %p3241_p9 = pnand %p3240_p8, %p3234_p5 }
 0x362   :  { %3007 = vmatprep.subr.bf16.mxu1 %v3170_v20 }
 0x363   :  { %2986 = vmatpush3.bf16.msra.mxu0 %v3169_v15 }
 0x364   :  { %2987 = vmatprep.subr.bf16.mxu0 %v3172_v21 }
 0x365   :  { %3008 = vmatpush3.bf16.msra.mxu1 %v3171_v23 }
 0x366   :  { %3009 = vmatprep.subr.bf16.mxu1 %v3174_v24 }
 0x367   :  { %2988 = vmatpush3.bf16.msra.mxu0 %v3173_v38 }
 0x368   :  { %2989 = vmatprep.subr.bf16.mxu0 %v3176_v25 }
 0x369   :  { %3010 = vmatpush3.bf16.msra.mxu1 %v3175_v14 }
 0x36a   :  { %3011 = vmatprep.subr.bf16.mxu1 %v3178_v27 }
 0x36b   :  { %2990 = vmatpush3.bf16.msra.mxu0 %v3177_v10 }
 0x36c   :  { %3019 = vmatprep.subr.bf16.mxu0 %v3180_v9 }
 0x36d   :  { %3012 = vmatpush3.bf16.msra.mxu1 %v3179_v41 }
 0x36e   :  { %2593 = vmatmul.mubr.bf16.vlgmr.msra.gmra.mxu0 %v1361_v32  ;;  %3041 = vmatprep.subr.bf16.mxu1 %v3182_v29 }
 0x36f   :  { %3020 = vmatpush3.bf16.msra.mxu0 %v3181_v30  ;;  %2672 = vmatprep.mubr.bf16.mxu0 %v1366_v33 }
 0x370   :  { %2633 = vmatmul.mubr.bf16.vlgmr.msra.gmra.mxu1 %v1363_v35  ;;  %3021 = vmatprep.subr.bf16.mxu0 %v3185_v57 }
 0x371   :  { %3042 = vmatpush3.bf16.msra.mxu1 %v3183_v34  ;;  %2712 = vmatprep.mubr.bf16.mxu1 %v1368_v36 }
 0x372   :  { %3043 = vmatprep.subr.bf16.mxu1 %v3187_v8 }
 0x373   :  { %3022 = vmatpush3.bf16.msra.mxu0 %v3186_v37 }
 0x374   :  { %3023 = vmatprep.subr.bf16.mxu0 %v3189_v39 }
 0x375   :  { %3044 = vmatpush3.bf16.msra.mxu1 %v3188_v40 }
 0x376   :  { %3045 = vmatprep.subr.bf16.mxu1 %v3191_v42 }
 0x377   :  { %3024 = vmatpush3.bf16.msra.mxu0 %v3190_v43 }
 0x378   :  { %3025 = vmatprep.subr.bf16.mxu0 %v3193_v4 }
 0x379   :  { %3046 = vmatpush3.bf16.msra.mxu1 %v3192_v45 }
 0x37a   :  { %3047 = vmatprep.subr.bf16.mxu1 %v3195_v46 }
 0x37b   :  { %3026 = vmatpush3.bf16.msra.mxu0 %v3194_v48 }
 0x37c   :  { %3027 = vmatprep.subr.bf16.mxu0 %v3197_v6 }
 0x37d   :  { %3048 = vmatpush3.bf16.msra.mxu1 %v3196_v49 }
 0x37e   :  { %3049 = vmatprep.subr.bf16.mxu1 %v3199_v50 }
 0x37f   :  { %3028 = vmatpush3.bf16.msra.mxu0 %v3198_v51 }
 0x380   :  { %3029 = vmatprep.subr.bf16.mxu0 %v3201_v52 }
 0x381   :  { %3050 = vmatpush3.bf16.msra.mxu1 %v3200_v53 }
 0x382   :  { %3051 = vmatprep.subr.bf16.mxu1 %v3203_v54 }
 0x383   :  { %3030 = vmatpush3.bf16.msra.mxu0 %v3202_v55 }
 0x384   :  { %3031 = vmatprep.subr.bf16.mxu0 %v3205_v56 }
 0x385   :  { %3052 = vmatpush3.bf16.msra.mxu1 %v3204_v58 }
 0x386   :  { %3053 = vmatprep.subr.bf16.mxu1 %v3207_v59 }
 0x387   :  { %3032 = vmatpush3.bf16.msra.mxu0 %v3206_v60 }
 0x388   :  { %3033 = vmatprep.subr.bf16.mxu0 %v3209_v61 }
 0x389   :  { %3054 = vmatpush3.bf16.msra.mxu1 %v3208_v62 }
 0x38a   :  { %3055 = vmatprep.subr.bf16.mxu1 %v3211_v63 }
 0x38b   :  { %3034 = vmatpush3.bf16.msra.mxu0 %v3210_v0 }
 0x38d   :  { %3056 = vmatpush3.bf16.msra.mxu1 %v3212_v1 }
 0x38e   :  { %2673 = vmatmul.mubr.bf16.vlgmr.msra.gmra.mxu0 %v1365_v2 }
 0x390   :  { %2713 = vmatmul.mubr.bf16.vlgmr.msra.gmra.mxu1 %v1367_v3 }
 0x3ee   :  { %v2903_v5 = vpop.f32.mrf.mxu0 }
 0x3f0   :  { %v2904_v12 = vpop.f32.mrf.mxu0  ;;  %v2925_v13 = vpop.f32.mrf.mxu1 }
 0x3f1   :  { %v2905_v16 = vadd.f32 %v2904_v12, %v2903_v5 }
 0x3f2   :  { %v2906_v7 = vpop.f32.mrf.mxu0  ;;  %v2926_v17 = vpop.f32.mrf.mxu1 }
 0x3f3   :  { %v2435_v18 = vadd.f32 %v2905_v16, %v2758_v11  ;;  %v2927_v19 = vadd.f32 %v2926_v17, %v2925_v13 }
 0x3f4   :  { %v2907_v20 = vpop.f32.mrf.mxu0  ;;  %v2928_v15 = vpop.f32.mrf.mxu1 }
 0x3f5   :  { %v2475_v21 = vadd.f32 %v2927_v19, %v2435_v18 }
 0x3f6   :  { %v2929_v22 = vpop.f32.mrf.mxu1 }
 0x40e   :  { %v2947_v23 = vpop.f32.mrf.mxu0 }
 0x410   :  { %v2948_v24 = vpop.f32.mrf.mxu0  ;;  %v2969_v38 = vpop.f32.mrf.mxu1 }
 0x411   :  { %v2949_v32 = vadd.f32 %v2948_v24, %v2947_v23 }
 0x412   :  { %v2950_v44 = vpop.f32.mrf.mxu0  ;;  %v2970_v25 = vpop.f32.mrf.mxu1 }
 0x413   :  { %v2515_v57 = vadd.f32 %v2949_v32, %v2475_v21  ;;  %v2971_v33 = vadd.f32 %v2970_v25, %v2969_v38 }
 0x414   :  { %v2951_v14 = vpop.f32.mrf.mxu0  ;;  %v2972_v26 = vpop.f32.mrf.mxu1 }
 0x415   :  { %v2555_v35 = vadd.f32 %v2971_v33, %v2515_v57 }
 0x416   :  { %v2973_v27 = vpop.f32.mrf.mxu1 }
 0x42e   :  { %v2991_v10 = vpop.f32.mrf.mxu0 }
 0x430   :  { %v2992_v28 = vpop.f32.mrf.mxu0  ;;  %v3013_v9 = vpop.f32.mrf.mxu1 }
 0x431   :  { %v2993_v34 = vadd.f32 %v2992_v28, %v2991_v10 }
 0x432   :  { %v2994_v41 = vpop.f32.mrf.mxu0  ;;  %v3014_v47 = vpop.f32.mrf.mxu1 }
 0x433   :  { %v2595_v8 = vadd.f32 %v2993_v34, %v2555_v35  ;;  %v3015_v36 = vadd.f32 %v3014_v47, %v3013_v9 }
 0x434   :  { %v2995_v29 = vpop.f32.mrf.mxu0  ;;  %v3016_v30 = vpop.f32.mrf.mxu1 }
 0x435   :  { %v2635_v42 = vadd.f32 %v3015_v36, %v2595_v8 }
 0x436   :  { %v3017_v31 = vpop.f32.mrf.mxu1 }
 0x44e   :  { %v3035_v37 = vpop.f32.mrf.mxu0 }
 0x450   :  { %v3036_v39 = vpop.f32.mrf.mxu0  ;;  %v3057_v40 = vpop.f32.mrf.mxu1 }
 0x451   :  { %v3037_v43 = vadd.f32 %v3036_v39, %v3035_v37 }
 0x452   :  { %v3038_v4 = vpop.f32.mrf.mxu0  ;;  %v3058_v45 = vpop.f32.mrf.mxu1 }
 0x453   :  { %v2675_v46 = vadd.f32 %v3037_v43, %v2635_v42  ;;  %v3059_v48 = vadd.f32 %v3058_v45, %v3057_v40 }
 0x454   :  { %v3039_v6 = vpop.f32.mrf.mxu0  ;;  %v3060_v49 = vpop.f32.mrf.mxu1 }
 0x455   :  { %v2715_v50 = vadd.f32 %v3059_v48, %v2675_v46 }
 0x456   :  { %v3061_v51 = vpop.f32.mrf.mxu1 }
 0x457   :  { %2720 = vst [vmem:[#allocation8] sm:$0x3] %v2715_v50 }
 0x458   :  { %3244 = shalt.err (!%p3241_p9)
}
 0x459   :  { %2730 = dma.vmem_to_hbm [thread:$0]  %s2728_s12, 32, %s3824_s8, [#allocation7]  }
 0x45a   :  { %3255 = dma.done.wait [#allocation7], 32  }
 0x45b   :  { %3256 = vsyncadd [#allocation7], 4294967264 }
 0x45c   :  { %2734 = vsyncpa [#allocation6], 1 }
 0x45d   :  { %2735 = vsyncpa [#allocation7], 1 }

</bundles_post_ra>
